<compile_context>
chip_gen: v7x
topology: tpu7x:2x2x1
jax: 0.10.0
libtpu: 0.0.40
codegen_flags: <defaults>
</compile_context>

<pallas_src>
import math
import functools

import jax
import jax.numpy as jnp
from jax.experimental import pallas as pl
from jax.experimental.pallas import tpu as pltpu

# ----------------------------- config ---------------------------------------
INPUT_DIM = 16
EMBED_DIM = 32
NUM_HEADS = 4
HIDDEN_DIM = 64
NUM_LAYERS = 2
SEQ = 8      # src.size(0)
BATCH = 2    # src.size(1)
HEAD_DIM = EMBED_DIM // NUM_HEADS
LN_EPS = 1e-5


# --------------------------- fused Pallas kernel -----------------------------
def _fused_encoder_kernel(src_ref, pos_ref, emb_w_ref, emb_b_ref,
                          in_w_ref, in_b_ref, out_w_ref, out_b_ref,
                          l1_w_ref, l1_b_ref, l2_w_ref, l2_b_ref,
                          ln1_g_ref, ln1_b_ref, ln2_g_ref, ln2_b_ref,
                          o_ref, attn_ref, *, seq, batch):
    """Whole TransformerEncoder forward on one VMEM-resident activation slab.

    Activations use batch-major rows: row (b*seq + s) holds token (s, b), so the
    per-(batch, head) Q/K/V tiles are contiguous static slices in VMEM.
    """
    scale = 1.0 / math.sqrt(HEAD_DIM)

    def layer_norm(h, g, bta):
        mu = jnp.mean(h, axis=-1, keepdims=True)
        d = h - mu
        var = jnp.mean(d * d, axis=-1, keepdims=True)
        return d * jax.lax.rsqrt(var + LN_EPS) * g + bta

    # ---- embedding + positional encoding (bias and pos folded into one add) ----
    x = jnp.dot(src_ref[...], emb_w_ref[...], preferred_element_type=jnp.float32)
    x = x + emb_b_ref[...] + pos_ref[...]

    for l in range(NUM_LAYERS):
        # ---- self-attention (fused QKV projection) ----
        qkv = jnp.dot(x, in_w_ref[l], preferred_element_type=jnp.float32) + in_b_ref[l]
        for b in range(batch):
            r0 = b * seq
            for h in range(NUM_HEADS):
                c0 = h * HEAD_DIM
                q_bh = qkv[r0:r0 + seq, c0:c0 + HEAD_DIM]
                k_bh = qkv[r0:r0 + seq, EMBED_DIM + c0:EMBED_DIM + c0 + HEAD_DIM]
                v_bh = qkv[r0:r0 + seq, 2 * EMBED_DIM + c0:2 * EMBED_DIM + c0 + HEAD_DIM]
                # q @ k^T without an explicit transpose (contract last dims).
                s = jax.lax.dot_general(
                    q_bh, k_bh, (((1,), (1,)), ((), ())),
                    preferred_element_type=jnp.float32) * scale
                m = jnp.max(s, axis=-1, keepdims=True)
                p = jnp.exp(s - m)
                p = p * pl.reciprocal(jnp.sum(p, axis=-1, keepdims=True), approx=True)
                attn_ref[r0:r0 + seq, c0:c0 + HEAD_DIM] = jnp.dot(
                    p, v_bh, preferred_element_type=jnp.float32)
        attn = jnp.dot(attn_ref[...], out_w_ref[l],
                       preferred_element_type=jnp.float32) + out_b_ref[l]
        x = layer_norm(x + attn, ln1_g_ref[l], ln1_b_ref[l])

        # ---- feed-forward ----
        h1 = jnp.dot(x, l1_w_ref[l], preferred_element_type=jnp.float32) + l1_b_ref[l]
        h1 = jnp.maximum(h1, 0.0)
        h2 = jnp.dot(h1, l2_w_ref[l], preferred_element_type=jnp.float32) + l2_b_ref[l]
        x = layer_norm(x + h2, ln2_g_ref[l], ln2_b_ref[l])

    o_ref[...] = x.astype(o_ref.dtype)


# --------------------------- parameter init ---------------------------------
def init_params(key):
    def nrm(k, shape, scale=0.1):
        return (scale * jax.random.normal(k, shape)).astype(jnp.float32)

    k_emb_w, k_emb_b, k_pos, k_layers = jax.random.split(key, 4)
    params = {
        "emb_w": nrm(k_emb_w, (EMBED_DIM, INPUT_DIM)),     # nn.Linear weight (out,in)
        "emb_b": nrm(k_emb_b, (EMBED_DIM,)),
        "pos": jax.random.normal(k_pos, (1, 1000, EMBED_DIM)).astype(jnp.float32),
        "layers": [],
    }
    lkeys = jax.random.split(k_layers, NUM_LAYERS)
    for lk in lkeys:
        ks = jax.random.split(lk, 8)
        params["layers"].append({
            "in_proj_w": nrm(ks[0], (3 * EMBED_DIM, EMBED_DIM)),
            "in_proj_b": nrm(ks[1], (3 * EMBED_DIM,)),
            "out_proj_w": nrm(ks[2], (EMBED_DIM, EMBED_DIM)),
            "out_proj_b": nrm(ks[3], (EMBED_DIM,)),
            "lin1_w": nrm(ks[4], (HIDDEN_DIM, EMBED_DIM)),
            "lin1_b": nrm(ks[5], (HIDDEN_DIM,)),
            "lin2_w": nrm(ks[6], (EMBED_DIM, HIDDEN_DIM)),
            "lin2_b": nrm(ks[7], (EMBED_DIM,)),
            "ln1_g": jnp.ones((EMBED_DIM,), jnp.float32),
            "ln1_b": jnp.zeros((EMBED_DIM,), jnp.float32),
            "ln2_g": jnp.ones((EMBED_DIM,), jnp.float32),
            "ln2_b": jnp.zeros((EMBED_DIM,), jnp.float32),
        })
    return params


def pack_params(params):
    """One-time weight prep: transpose to (in, out) layout and stack per layer."""
    layers = params["layers"]
    stack_t = lambda key: jnp.stack([lp[key].T for lp in layers])
    stack_r = lambda key: jnp.stack([lp[key].reshape(1, -1) for lp in layers])
    return {
        "emb_w": params["emb_w"].T,                        # (Din, E)
        "emb_b": params["emb_b"].reshape(1, EMBED_DIM),
        "pos": params["pos"],
        "in_w": stack_t("in_proj_w"),                      # (L, E, 3E)
        "in_b": stack_r("in_proj_b"),                      # (L, 1, 3E)
        "out_w": stack_t("out_proj_w"),                    # (L, E, E)
        "out_b": stack_r("out_proj_b"),
        "l1_w": stack_t("lin1_w"),                         # (L, E, H)
        "l1_b": stack_r("lin1_b"),
        "l2_w": stack_t("lin2_w"),                         # (L, H, E)
        "l2_b": stack_r("lin2_b"),
        "ln1_g": stack_r("ln1_g"),
        "ln1_b": stack_r("ln1_b"),
        "ln2_g": stack_r("ln2_g"),
        "ln2_b": stack_r("ln2_b"),
    }


# ----------------------------- forward pass ----------------------------------
def transformer_encoder_forward(src, packed):
    S, B, Din = src.shape
    # batch-major 2-D activation layout: row b*S + s  <->  token (s, b)
    src_bm = src.transpose(1, 0, 2).reshape(B * S, Din)
    # pos-enc sliced by src.size(1) (= B), exactly as the PyTorch module does,
    # broadcast over the sequence dimension, laid out batch-major.
    pos_rows = jnp.broadcast_to(packed["pos"][0, :B, None, :],
                                (B, S, EMBED_DIM)).reshape(B * S, EMBED_DIM)

    kernel = functools.partial(_fused_encoder_kernel, seq=S, batch=B)
    out2d = pl.pallas_call(
        kernel,
        out_shape=jax.ShapeDtypeStruct((B * S, EMBED_DIM), jnp.float32),
        scratch_shapes=[pltpu.VMEM((B * S, EMBED_DIM), jnp.float32)],
    )(src_bm, pos_rows, packed["emb_w"], packed["emb_b"],
      packed["in_w"], packed["in_b"], packed["out_w"], packed["out_b"],
      packed["l1_w"], packed["l1_b"], packed["l2_w"], packed["l2_b"],
      packed["ln1_g"], packed["ln1_b"], packed["ln2_g"], packed["ln2_b"])

    return out2d.reshape(B, S, EMBED_DIM).transpose(1, 0, 2)


# ------------------------ pure-JAX reference (check) -------------------------
def _ref_ln(x, g, b):
    mu = jnp.mean(x, axis=-1, keepdims=True)
    var = jnp.mean((x - mu) ** 2, axis=-1, keepdims=True)
    return (x - mu) * jax.lax.rsqrt(var + LN_EPS) * g + b


def ref_forward(src, params):
    lin = lambda x, w, b: x @ w.T + b
    S, B, _ = src.shape
    x = lin(src, params["emb_w"], params["emb_b"]) + params["pos"][:, :B, :]
    for p in params["layers"]:
        x2d = x.reshape(S * B, EMBED_DIM)
        qkv = lin(x2d, p["in_proj_w"], p["in_proj_b"])
        q, k, v = jnp.split(qkv, 3, -1)
        heads = lambda t: t.reshape(S, B * NUM_HEADS, HEAD_DIM).transpose(1, 0, 2)
        s = jnp.einsum("bqd,bkd->bqk", heads(q), heads(k)) / math.sqrt(HEAD_DIM)
        o = jnp.einsum("bqk,bkd->bqd", jax.nn.softmax(s, -1), heads(v))
        o = o.transpose(1, 0, 2).reshape(S * B, EMBED_DIM)
        o = lin(o, p["out_proj_w"], p["out_proj_b"])
        h = _ref_ln(x2d + o, p["ln1_g"], p["ln1_b"])
        ff = lin(jax.nn.relu(lin(h, p["lin1_w"], p["lin1_b"])), p["lin2_w"], p["lin2_b"])
        x = _ref_ln(h + ff, p["ln2_g"], p["ln2_b"]).reshape(S, B, EMBED_DIM)
    return x


# --------------------------------- main --------------------------------------
if __name__ == "__main__":
    key = jax.random.PRNGKey(0)
    k_src, k_params = jax.random.split(key)
    src = jax.random.normal(k_src, (SEQ, BATCH, INPUT_DIM), dtype=jnp.float32)
    params = init_params(k_params)
    packed = pack_params(params)   # one-time weight transpose/stack (not per forward)

    out = jax.jit(transformer_encoder_forward)(src, packed)
    out = jax.block_until_ready(out)

    ref = ref_forward(src, params)
    assert out.shape == (SEQ, BATCH, EMBED_DIM)
    assert bool(jnp.allclose(out, ref, atol=1e-2, rtol=1e-2)), "mismatch vs reference"

    print("KERNEL_OK")
</pallas_src>

<mosaic_0001>
module attributes {stable_mosaic.version = 11 : i64} {
  func.func @_fused_encoder_kernel(%arg0: memref<16x16xf32, #tpu.memory_space<vmem>>, %arg1: memref<16x32xf32, #tpu.memory_space<vmem>>, %arg2: memref<16x32xf32, #tpu.memory_space<vmem>>, %arg3: memref<1x32xf32, #tpu.memory_space<vmem>>, %arg4: memref<2x32x96xf32, #tpu.memory_space<vmem>>, %arg5: memref<2x1x96xf32, #tpu.memory_space<vmem>>, %arg6: memref<2x32x32xf32, #tpu.memory_space<vmem>>, %arg7: memref<2x1x32xf32, #tpu.memory_space<vmem>>, %arg8: memref<2x32x64xf32, #tpu.memory_space<vmem>>, %arg9: memref<2x1x64xf32, #tpu.memory_space<vmem>>, %arg10: memref<2x64x32xf32, #tpu.memory_space<vmem>>, %arg11: memref<2x1x32xf32, #tpu.memory_space<vmem>>, %arg12: memref<2x1x32xf32, #tpu.memory_space<vmem>>, %arg13: memref<2x1x32xf32, #tpu.memory_space<vmem>>, %arg14: memref<2x1x32xf32, #tpu.memory_space<vmem>>, %arg15: memref<2x1x32xf32, #tpu.memory_space<vmem>>, %arg16: memref<16x32xf32, #tpu.memory_space<vmem>>, %arg17: memref<16x32xf32, #tpu.memory_space<vmem>>) attributes {dimension_semantics = [], scalar_prefetch = 0 : i64, scratch_operands = 1 : i64, tpu.core_type = #tpu.core_type<tc>} {
    %c0 = arith.constant 0 : index
    %c0_0 = arith.constant 0 : index
    %0 = vector.load %arg0[%c0, %c0_0] : memref<16x16xf32, #tpu.memory_space<vmem>>, vector<16x16xf32>
    %c0_1 = arith.constant 0 : index
    %c0_2 = arith.constant 0 : index
    %1 = vector.load %arg2[%c0_1, %c0_2] : memref<16x32xf32, #tpu.memory_space<vmem>>, vector<16x32xf32>
    %cst = arith.constant dense<0.000000e+00> : vector<16x32xf32>
    %2 = tpu.matmul %0, %1, %cst {dimension_numbers = #tpu.dot_dimension_numbers<[1], [0], [0], [1], [0, 0, 1, 1], [], []>} : vector<16x16xf32>, vector<16x32xf32>, vector<16x32xf32> -> vector<16x32xf32>
    %c0_3 = arith.constant 0 : index
    %c0_4 = arith.constant 0 : index
    %3 = vector.load %arg3[%c0_3, %c0_4] : memref<1x32xf32, #tpu.memory_space<vmem>>, vector<1x32xf32>
    %4 = vector.broadcast %3 : vector<1x32xf32> to vector<16x32xf32>
    %5 = arith.addf %2, %4 : vector<16x32xf32>
    %c0_5 = arith.constant 0 : index
    %c0_6 = arith.constant 0 : index
    %6 = vector.load %arg1[%c0_5, %c0_6] : memref<16x32xf32, #tpu.memory_space<vmem>>, vector<16x32xf32>
    %7 = arith.addf %5, %6 : vector<16x32xf32>
    %c0_7 = arith.constant 0 : index
    %c0_8 = arith.constant 0 : index
    %c0_9 = arith.constant 0 : index
    %8 = vector.load %arg4[%c0_7, %c0_8, %c0_9] : memref<2x32x96xf32, #tpu.memory_space<vmem>>, vector<1x32x96xf32>
    %9 = vector.shape_cast %8 : vector<1x32x96xf32> to vector<32x96xf32>
    %cst_10 = arith.constant dense<0.000000e+00> : vector<16x96xf32>
    %10 = tpu.matmul %7, %9, %cst_10 {dimension_numbers = #tpu.dot_dimension_numbers<[1], [0], [0], [1], [0, 0, 1, 1], [], []>} : vector<16x32xf32>, vector<32x96xf32>, vector<16x96xf32> -> vector<16x96xf32>
    %c0_11 = arith.constant 0 : index
    %c0_12 = arith.constant 0 : index
    %c0_13 = arith.constant 0 : index
    %11 = vector.load %arg5[%c0_11, %c0_12, %c0_13] : memref<2x1x96xf32, #tpu.memory_space<vmem>>, vector<1x1x96xf32>
    %12 = vector.shape_cast %11 : vector<1x1x96xf32> to vector<1x96xf32>
    %13 = vector.broadcast %12 : vector<1x96xf32> to vector<16x96xf32>
    %14 = arith.addf %10, %13 : vector<16x96xf32>
    %15 = vector.extract_strided_slice %14 {offsets = [0, 0], sizes = [8, 8], strides = [1, 1]} : vector<16x96xf32> to vector<8x8xf32>
    %16 = vector.extract_strided_slice %14 {offsets = [0, 32], sizes = [8, 8], strides = [1, 1]} : vector<16x96xf32> to vector<8x8xf32>
    %17 = vector.extract_strided_slice %14 {offsets = [0, 64], sizes = [8, 8], strides = [1, 1]} : vector<16x96xf32> to vector<8x8xf32>
    %cst_14 = arith.constant dense<0.000000e+00> : vector<8x8xf32>
    %18 = tpu.matmul %15, %16, %cst_14 {dimension_numbers = #tpu.dot_dimension_numbers<[1], [1], [0], [0], [0, 0, 1, 0], [], []>} : vector<8x8xf32>, vector<8x8xf32>, vector<8x8xf32> -> vector<8x8xf32>
    %cst_15 = arith.constant 0.353553385 : f32
    %19 = vector.broadcast %cst_15 : f32 to vector<8x8xf32>
    %20 = arith.mulf %18, %19 : vector<8x8xf32>
    %cst_16 = arith.constant dense<0xFF800000> : vector<8xf32>
    %21 = vector.multi_reduction <maximumf>, %20, %cst_16 [1] : vector<8x8xf32> to vector<8xf32>
    %22 = vector.shape_cast %21 : vector<8xf32> to vector<8x1xf32>
    %23 = vector.broadcast %22 : vector<8x1xf32> to vector<8x8xf32>
    %24 = arith.subf %20, %23 : vector<8x8xf32>
    %25 = math.exp %24 : vector<8x8xf32>
    %cst_17 = arith.constant dense<0.000000e+00> : vector<8xf32>
    %26 = vector.multi_reduction <add>, %25, %cst_17 [1] : vector<8x8xf32> to vector<8xf32>
    %27 = vector.shape_cast %26 : vector<8xf32> to vector<8x1xf32>
    %28 = tpu.reciprocal %27 {approx = true} : vector<8x1xf32> -> vector<8x1xf32>
    %29 = vector.broadcast %28 : vector<8x1xf32> to vector<8x8xf32>
    %30 = arith.mulf %25, %29 : vector<8x8xf32>
    %cst_18 = arith.constant dense<0.000000e+00> : vector<8x8xf32>
    %31 = tpu.matmul %30, %17, %cst_18 {dimension_numbers = #tpu.dot_dimension_numbers<[1], [0], [0], [1], [0, 0, 1, 1], [], []>} : vector<8x8xf32>, vector<8x8xf32>, vector<8x8xf32> -> vector<8x8xf32>
    %c0_19 = arith.constant 0 : index
    %c0_20 = arith.constant 0 : index
    %32 = vector.load %arg17[%c0_19, %c0_20] : memref<16x32xf32, #tpu.memory_space<vmem>>, vector<8x8xf32>
    tpu.vector_store %arg17[%c0_19, %c0_20], %31 {strides = array<i32>} : memref<16x32xf32, #tpu.memory_space<vmem>>, vector<8x8xf32>,
    %33 = vector.extract_strided_slice %14 {offsets = [0, 8], sizes = [8, 8], strides = [1, 1]} : vector<16x96xf32> to vector<8x8xf32>
    %34 = vector.extract_strided_slice %14 {offsets = [0, 40], sizes = [8, 8], strides = [1, 1]} : vector<16x96xf32> to vector<8x8xf32>
    %35 = vector.extract_strided_slice %14 {offsets = [0, 72], sizes = [8, 8], strides = [1, 1]} : vector<16x96xf32> to vector<8x8xf32>
    %cst_21 = arith.constant dense<0.000000e+00> : vector<8x8xf32>
    %36 = tpu.matmul %33, %34, %cst_21 {dimension_numbers = #tpu.dot_dimension_numbers<[1], [1], [0], [0], [0, 0, 1, 0], [], []>} : vector<8x8xf32>, vector<8x8xf32>, vector<8x8xf32> -> vector<8x8xf32>
    %cst_22 = arith.constant 0.353553385 : f32
    %37 = vector.broadcast %cst_22 : f32 to vector<8x8xf32>
    %38 = arith.mulf %36, %37 : vector<8x8xf32>
    %cst_23 = arith.constant dense<0xFF800000> : vector<8xf32>
    %39 = vector.multi_reduction <maximumf>, %38, %cst_23 [1] : vector<8x8xf32> to vector<8xf32>
    %40 = vector.shape_cast %39 : vector<8xf32> to vector<8x1xf32>
    %41 = vector.broadcast %40 : vector<8x1xf32> to vector<8x8xf32>
    %42 = arith.subf %38, %41 : vector<8x8xf32>
    %43 = math.exp %42 : vector<8x8xf32>
    %cst_24 = arith.constant dense<0.000000e+00> : vector<8xf32>
    %44 = vector.multi_reduction <add>, %43, %cst_24 [1] : vector<8x8xf32> to vector<8xf32>
    %45 = vector.shape_cast %44 : vector<8xf32> to vector<8x1xf32>
    %46 = tpu.reciprocal %45 {approx = true} : vector<8x1xf32> -> vector<8x1xf32>
    %47 = vector.broadcast %46 : vector<8x1xf32> to vector<8x8xf32>
    %48 = arith.mulf %43, %47 : vector<8x8xf32>
    %cst_25 = arith.constant dense<0.000000e+00> : vector<8x8xf32>
    %49 = tpu.matmul %48, %35, %cst_25 {dimension_numbers = #tpu.dot_dimension_numbers<[1], [0], [0], [1], [0, 0, 1, 1], [], []>} : vector<8x8xf32>, vector<8x8xf32>, vector<8x8xf32> -> vector<8x8xf32>
    %c0_26 = arith.constant 0 : index
    %c8 = arith.constant 8 : index
    %50 = vector.load %arg17[%c0_26, %c8] : memref<16x32xf32, #tpu.memory_space<vmem>>, vector<8x8xf32>
    tpu.vector_store %arg17[%c0_26, %c8], %49 {strides = array<i32>} : memref<16x32xf32, #tpu.memory_space<vmem>>, vector<8x8xf32>,
    %51 = vector.extract_strided_slice %14 {offsets = [0, 16], sizes = [8, 8], strides = [1, 1]} : vector<16x96xf32> to vector<8x8xf32>
    %52 = vector.extract_strided_slice %14 {offsets = [0, 48], sizes = [8, 8], strides = [1, 1]} : vector<16x96xf32> to vector<8x8xf32>
    %53 = vector.extract_strided_slice %14 {offsets = [0, 80], sizes = [8, 8], strides = [1, 1]} : vector<16x96xf32> to vector<8x8xf32>
    %cst_27 = arith.constant dense<0.000000e+00> : vector<8x8xf32>
    %54 = tpu.matmul %51, %52, %cst_27 {dimension_numbers = #tpu.dot_dimension_numbers<[1], [1], [0], [0], [0, 0, 1, 0], [], []>} : vector<8x8xf32>, vector<8x8xf32>, vector<8x8xf32> -> vector<8x8xf32>
    %cst_28 = arith.constant 0.353553385 : f32
    %55 = vector.broadcast %cst_28 : f32 to vector<8x8xf32>
    %56 = arith.mulf %54, %55 : vector<8x8xf32>
    %cst_29 = arith.constant dense<0xFF800000> : vector<8xf32>
    %57 = vector.multi_reduction <maximumf>, %56, %cst_29 [1] : vector<8x8xf32> to vector<8xf32>
    %58 = vector.shape_cast %57 : vector<8xf32> to vector<8x1xf32>
    %59 = vector.broadcast %58 : vector<8x1xf32> to vector<8x8xf32>
    %60 = arith.subf %56, %59 : vector<8x8xf32>
    %61 = math.exp %60 : vector<8x8xf32>
    %cst_30 = arith.constant dense<0.000000e+00> : vector<8xf32>
    %62 = vector.multi_reduction <add>, %61, %cst_30 [1] : vector<8x8xf32> to vector<8xf32>
    %63 = vector.shape_cast %62 : vector<8xf32> to vector<8x1xf32>
    %64 = tpu.reciprocal %63 {approx = true} : vector<8x1xf32> -> vector<8x1xf32>
    %65 = vector.broadcast %64 : vector<8x1xf32> to vector<8x8xf32>
    %66 = arith.mulf %61, %65 : vector<8x8xf32>
    %cst_31 = arith.constant dense<0.000000e+00> : vector<8x8xf32>
    %67 = tpu.matmul %66, %53, %cst_31 {dimension_numbers = #tpu.dot_dimension_numbers<[1], [0], [0], [1], [0, 0, 1, 1], [], []>} : vector<8x8xf32>, vector<8x8xf32>, vector<8x8xf32> -> vector<8x8xf32>
    %c0_32 = arith.constant 0 : index
    %c16 = arith.constant 16 : index
    %68 = vector.load %arg17[%c0_32, %c16] : memref<16x32xf32, #tpu.memory_space<vmem>>, vector<8x8xf32>
    tpu.vector_store %arg17[%c0_32, %c16], %67 {strides = array<i32>} : memref<16x32xf32, #tpu.memory_space<vmem>>, vector<8x8xf32>,
    %69 = vector.extract_strided_slice %14 {offsets = [0, 24], sizes = [8, 8], strides = [1, 1]} : vector<16x96xf32> to vector<8x8xf32>
    %70 = vector.extract_strided_slice %14 {offsets = [0, 56], sizes = [8, 8], strides = [1, 1]} : vector<16x96xf32> to vector<8x8xf32>
    %71 = vector.extract_strided_slice %14 {offsets = [0, 88], sizes = [8, 8], strides = [1, 1]} : vector<16x96xf32> to vector<8x8xf32>
    %cst_33 = arith.constant dense<0.000000e+00> : vector<8x8xf32>
    %72 = tpu.matmul %69, %70, %cst_33 {dimension_numbers = #tpu.dot_dimension_numbers<[1], [1], [0], [0], [0, 0, 1, 0], [], []>} : vector<8x8xf32>, vector<8x8xf32>, vector<8x8xf32> -> vector<8x8xf32>
    %cst_34 = arith.constant 0.353553385 : f32
    %73 = vector.broadcast %cst_34 : f32 to vector<8x8xf32>
    %74 = arith.mulf %72, %73 : vector<8x8xf32>
    %cst_35 = arith.constant dense<0xFF800000> : vector<8xf32>
    %75 = vector.multi_reduction <maximumf>, %74, %cst_35 [1] : vector<8x8xf32> to vector<8xf32>
    %76 = vector.shape_cast %75 : vector<8xf32> to vector<8x1xf32>
    %77 = vector.broadcast %76 : vector<8x1xf32> to vector<8x8xf32>
    %78 = arith.subf %74, %77 : vector<8x8xf32>
    %79 = math.exp %78 : vector<8x8xf32>
    %cst_36 = arith.constant dense<0.000000e+00> : vector<8xf32>
    %80 = vector.multi_reduction <add>, %79, %cst_36 [1] : vector<8x8xf32> to vector<8xf32>
    %81 = vector.shape_cast %80 : vector<8xf32> to vector<8x1xf32>
    %82 = tpu.reciprocal %81 {approx = true} : vector<8x1xf32> -> vector<8x1xf32>
    %83 = vector.broadcast %82 : vector<8x1xf32> to vector<8x8xf32>
    %84 = arith.mulf %79, %83 : vector<8x8xf32>
    %cst_37 = arith.constant dense<0.000000e+00> : vector<8x8xf32>
    %85 = tpu.matmul %84, %71, %cst_37 {dimension_numbers = #tpu.dot_dimension_numbers<[1], [0], [0], [1], [0, 0, 1, 1], [], []>} : vector<8x8xf32>, vector<8x8xf32>, vector<8x8xf32> -> vector<8x8xf32>
    %c0_38 = arith.constant 0 : index
    %c24 = arith.constant 24 : index
    %86 = vector.load %arg17[%c0_38, %c24] : memref<16x32xf32, #tpu.memory_space<vmem>>, vector<8x8xf32>
    tpu.vector_store %arg17[%c0_38, %c24], %85 {strides = array<i32>} : memref<16x32xf32, #tpu.memory_space<vmem>>, vector<8x8xf32>,
    %87 = vector.extract_strided_slice %14 {offsets = [8, 0], sizes = [8, 8], strides = [1, 1]} : vector<16x96xf32> to vector<8x8xf32>
    %88 = vector.extract_strided_slice %14 {offsets = [8, 32], sizes = [8, 8], strides = [1, 1]} : vector<16x96xf32> to vector<8x8xf32>
    %89 = vector.extract_strided_slice %14 {offsets = [8, 64], sizes = [8, 8], strides = [1, 1]} : vector<16x96xf32> to vector<8x8xf32>
    %cst_39 = arith.constant dense<0.000000e+00> : vector<8x8xf32>
    %90 = tpu.matmul %87, %88, %cst_39 {dimension_numbers = #tpu.dot_dimension_numbers<[1], [1], [0], [0], [0, 0, 1, 0], [], []>} : vector<8x8xf32>, vector<8x8xf32>, vector<8x8xf32> -> vector<8x8xf32>
    %cst_40 = arith.constant 0.353553385 : f32
    %91 = vector.broadcast %cst_40 : f32 to vector<8x8xf32>
    %92 = arith.mulf %90, %91 : vector<8x8xf32>
    %cst_41 = arith.constant dense<0xFF800000> : vector<8xf32>
    %93 = vector.multi_reduction <maximumf>, %92, %cst_41 [1] : vector<8x8xf32> to vector<8xf32>
    %94 = vector.shape_cast %93 : vector<8xf32> to vector<8x1xf32>
    %95 = vector.broadcast %94 : vector<8x1xf32> to vector<8x8xf32>
    %96 = arith.subf %92, %95 : vector<8x8xf32>
    %97 = math.exp %96 : vector<8x8xf32>
    %cst_42 = arith.constant dense<0.000000e+00> : vector<8xf32>
    %98 = vector.multi_reduction <add>, %97, %cst_42 [1] : vector<8x8xf32> to vector<8xf32>
    %99 = vector.shape_cast %98 : vector<8xf32> to vector<8x1xf32>
    %100 = tpu.reciprocal %99 {approx = true} : vector<8x1xf32> -> vector<8x1xf32>
    %101 = vector.broadcast %100 : vector<8x1xf32> to vector<8x8xf32>
    %102 = arith.mulf %97, %101 : vector<8x8xf32>
    %cst_43 = arith.constant dense<0.000000e+00> : vector<8x8xf32>
    %103 = tpu.matmul %102, %89, %cst_43 {dimension_numbers = #tpu.dot_dimension_numbers<[1], [0], [0], [1], [0, 0, 1, 1], [], []>} : vector<8x8xf32>, vector<8x8xf32>, vector<8x8xf32> -> vector<8x8xf32>
    %c8_44 = arith.constant 8 : index
    %c0_45 = arith.constant 0 : index
    %104 = vector.load %arg17[%c8_44, %c0_45] : memref<16x32xf32, #tpu.memory_space<vmem>>, vector<8x8xf32>
    tpu.vector_store %arg17[%c8_44, %c0_45], %103 {strides = array<i32>} : memref<16x32xf32, #tpu.memory_space<vmem>>, vector<8x8xf32>,
    %105 = vector.extract_strided_slice %14 {offsets = [8, 8], sizes = [8, 8], strides = [1, 1]} : vector<16x96xf32> to vector<8x8xf32>
    %106 = vector.extract_strided_slice %14 {offsets = [8, 40], sizes = [8, 8], strides = [1, 1]} : vector<16x96xf32> to vector<8x8xf32>
    %107 = vector.extract_strided_slice %14 {offsets = [8, 72], sizes = [8, 8], strides = [1, 1]} : vector<16x96xf32> to vector<8x8xf32>
    %cst_46 = arith.constant dense<0.000000e+00> : vector<8x8xf32>
    %108 = tpu.matmul %105, %106, %cst_46 {dimension_numbers = #tpu.dot_dimension_numbers<[1], [1], [0], [0], [0, 0, 1, 0], [], []>} : vector<8x8xf32>, vector<8x8xf32>, vector<8x8xf32> -> vector<8x8xf32>
    %cst_47 = arith.constant 0.353553385 : f32
    %109 = vector.broadcast %cst_47 : f32 to vector<8x8xf32>
    %110 = arith.mulf %108, %109 : vector<8x8xf32>
    %cst_48 = arith.constant dense<0xFF800000> : vector<8xf32>
    %111 = vector.multi_reduction <maximumf>, %110, %cst_48 [1] : vector<8x8xf32> to vector<8xf32>
    %112 = vector.shape_cast %111 : vector<8xf32> to vector<8x1xf32>
    %113 = vector.broadcast %112 : vector<8x1xf32> to vector<8x8xf32>
    %114 = arith.subf %110, %113 : vector<8x8xf32>
    %115 = math.exp %114 : vector<8x8xf32>
    %cst_49 = arith.constant dense<0.000000e+00> : vector<8xf32>
    %116 = vector.multi_reduction <add>, %115, %cst_49 [1] : vector<8x8xf32> to vector<8xf32>
    %117 = vector.shape_cast %116 : vector<8xf32> to vector<8x1xf32>
    %118 = tpu.reciprocal %117 {approx = true} : vector<8x1xf32> -> vector<8x1xf32>
    %119 = vector.broadcast %118 : vector<8x1xf32> to vector<8x8xf32>
    %120 = arith.mulf %115, %119 : vector<8x8xf32>
    %cst_50 = arith.constant dense<0.000000e+00> : vector<8x8xf32>
    %121 = tpu.matmul %120, %107, %cst_50 {dimension_numbers = #tpu.dot_dimension_numbers<[1], [0], [0], [1], [0, 0, 1, 1], [], []>} : vector<8x8xf32>, vector<8x8xf32>, vector<8x8xf32> -> vector<8x8xf32>
    %c8_51 = arith.constant 8 : index
    %c8_52 = arith.constant 8 : index
    %122 = vector.load %arg17[%c8_51, %c8_52] : memref<16x32xf32, #tpu.memory_space<vmem>>, vector<8x8xf32>
    tpu.vector_store %arg17[%c8_51, %c8_52], %121 {strides = array<i32>} : memref<16x32xf32, #tpu.memory_space<vmem>>, vector<8x8xf32>,
    %123 = vector.extract_strided_slice %14 {offsets = [8, 16], sizes = [8, 8], strides = [1, 1]} : vector<16x96xf32> to vector<8x8xf32>
    %124 = vector.extract_strided_slice %14 {offsets = [8, 48], sizes = [8, 8], strides = [1, 1]} : vector<16x96xf32> to vector<8x8xf32>
    %125 = vector.extract_strided_slice %14 {offsets = [8, 80], sizes = [8, 8], strides = [1, 1]} : vector<16x96xf32> to vector<8x8xf32>
    %cst_53 = arith.constant dense<0.000000e+00> : vector<8x8xf32>
    %126 = tpu.matmul %123, %124, %cst_53 {dimension_numbers = #tpu.dot_dimension_numbers<[1], [1], [0], [0], [0, 0, 1, 0], [], []>} : vector<8x8xf32>, vector<8x8xf32>, vector<8x8xf32> -> vector<8x8xf32>
    %cst_54 = arith.constant 0.353553385 : f32
    %127 = vector.broadcast %cst_54 : f32 to vector<8x8xf32>
    %128 = arith.mulf %126, %127 : vector<8x8xf32>
    %cst_55 = arith.constant dense<0xFF800000> : vector<8xf32>
    %129 = vector.multi_reduction <maximumf>, %128, %cst_55 [1] : vector<8x8xf32> to vector<8xf32>
    %130 = vector.shape_cast %129 : vector<8xf32> to vector<8x1xf32>
    %131 = vector.broadcast %130 : vector<8x1xf32> to vector<8x8xf32>
    %132 = arith.subf %128, %131 : vector<8x8xf32>
    %133 = math.exp %132 : vector<8x8xf32>
    %cst_56 = arith.constant dense<0.000000e+00> : vector<8xf32>
    %134 = vector.multi_reduction <add>, %133, %cst_56 [1] : vector<8x8xf32> to vector<8xf32>
    %135 = vector.shape_cast %134 : vector<8xf32> to vector<8x1xf32>
    %136 = tpu.reciprocal %135 {approx = true} : vector<8x1xf32> -> vector<8x1xf32>
    %137 = vector.broadcast %136 : vector<8x1xf32> to vector<8x8xf32>
    %138 = arith.mulf %133, %137 : vector<8x8xf32>
    %cst_57 = arith.constant dense<0.000000e+00> : vector<8x8xf32>
    %139 = tpu.matmul %138, %125, %cst_57 {dimension_numbers = #tpu.dot_dimension_numbers<[1], [0], [0], [1], [0, 0, 1, 1], [], []>} : vector<8x8xf32>, vector<8x8xf32>, vector<8x8xf32> -> vector<8x8xf32>
    %c8_58 = arith.constant 8 : index
    %c16_59 = arith.constant 16 : index
    %140 = vector.load %arg17[%c8_58, %c16_59] : memref<16x32xf32, #tpu.memory_space<vmem>>, vector<8x8xf32>
    tpu.vector_store %arg17[%c8_58, %c16_59], %139 {strides = array<i32>} : memref<16x32xf32, #tpu.memory_space<vmem>>, vector<8x8xf32>,
    %141 = vector.extract_strided_slice %14 {offsets = [8, 24], sizes = [8, 8], strides = [1, 1]} : vector<16x96xf32> to vector<8x8xf32>
    %142 = vector.extract_strided_slice %14 {offsets = [8, 56], sizes = [8, 8], strides = [1, 1]} : vector<16x96xf32> to vector<8x8xf32>
    %143 = vector.extract_strided_slice %14 {offsets = [8, 88], sizes = [8, 8], strides = [1, 1]} : vector<16x96xf32> to vector<8x8xf32>
    %cst_60 = arith.constant dense<0.000000e+00> : vector<8x8xf32>
    %144 = tpu.matmul %141, %142, %cst_60 {dimension_numbers = #tpu.dot_dimension_numbers<[1], [1], [0], [0], [0, 0, 1, 0], [], []>} : vector<8x8xf32>, vector<8x8xf32>, vector<8x8xf32> -> vector<8x8xf32>
    %cst_61 = arith.constant 0.353553385 : f32
    %145 = vector.broadcast %cst_61 : f32 to vector<8x8xf32>
    %146 = arith.mulf %144, %145 : vector<8x8xf32>
    %cst_62 = arith.constant dense<0xFF800000> : vector<8xf32>
    %147 = vector.multi_reduction <maximumf>, %146, %cst_62 [1] : vector<8x8xf32> to vector<8xf32>
    %148 = vector.shape_cast %147 : vector<8xf32> to vector<8x1xf32>
    %149 = vector.broadcast %148 : vector<8x1xf32> to vector<8x8xf32>
    %150 = arith.subf %146, %149 : vector<8x8xf32>
    %151 = math.exp %150 : vector<8x8xf32>
    %cst_63 = arith.constant dense<0.000000e+00> : vector<8xf32>
    %152 = vector.multi_reduction <add>, %151, %cst_63 [1] : vector<8x8xf32> to vector<8xf32>
    %153 = vector.shape_cast %152 : vector<8xf32> to vector<8x1xf32>
    %154 = tpu.reciprocal %153 {approx = true} : vector<8x1xf32> -> vector<8x1xf32>
    %155 = vector.broadcast %154 : vector<8x1xf32> to vector<8x8xf32>
    %156 = arith.mulf %151, %155 : vector<8x8xf32>
    %cst_64 = arith.constant dense<0.000000e+00> : vector<8x8xf32>
    %157 = tpu.matmul %156, %143, %cst_64 {dimension_numbers = #tpu.dot_dimension_numbers<[1], [0], [0], [1], [0, 0, 1, 1], [], []>} : vector<8x8xf32>, vector<8x8xf32>, vector<8x8xf32> -> vector<8x8xf32>
    %c8_65 = arith.constant 8 : index
    %c24_66 = arith.constant 24 : index
    %158 = vector.load %arg17[%c8_65, %c24_66] : memref<16x32xf32, #tpu.memory_space<vmem>>, vector<8x8xf32>
    tpu.vector_store %arg17[%c8_65, %c24_66], %157 {strides = array<i32>} : memref<16x32xf32, #tpu.memory_space<vmem>>, vector<8x8xf32>,
    %c0_67 = arith.constant 0 : index
    %c0_68 = arith.constant 0 : index
    %159 = vector.load %arg17[%c0_67, %c0_68] : memref<16x32xf32, #tpu.memory_space<vmem>>, vector<16x32xf32>
    %c0_69 = arith.constant 0 : index
    %c0_70 = arith.constant 0 : index
    %c0_71 = arith.constant 0 : index
    %160 = vector.load %arg6[%c0_69, %c0_70, %c0_71] : memref<2x32x32xf32, #tpu.memory_space<vmem>>, vector<1x32x32xf32>
    %161 = vector.shape_cast %160 : vector<1x32x32xf32> to vector<32x32xf32>
    %cst_72 = arith.constant dense<0.000000e+00> : vector<16x32xf32>
    %162 = tpu.matmul %159, %161, %cst_72 {dimension_numbers = #tpu.dot_dimension_numbers<[1], [0], [0], [1], [0, 0, 1, 1], [], []>} : vector<16x32xf32>, vector<32x32xf32>, vector<16x32xf32> -> vector<16x32xf32>
    %c0_73 = arith.constant 0 : index
    %c0_74 = arith.constant 0 : index
    %c0_75 = arith.constant 0 : index
    %163 = vector.load %arg7[%c0_73, %c0_74, %c0_75] : memref<2x1x32xf32, #tpu.memory_space<vmem>>, vector<1x1x32xf32>
    %164 = vector.shape_cast %163 : vector<1x1x32xf32> to vector<1x32xf32>
    %165 = vector.broadcast %164 : vector<1x32xf32> to vector<16x32xf32>
    %166 = arith.addf %162, %165 : vector<16x32xf32>
    %167 = arith.addf %7, %166 : vector<16x32xf32>
    %c0_76 = arith.constant 0 : index
    %c0_77 = arith.constant 0 : index
    %c0_78 = arith.constant 0 : index
    %168 = vector.load %arg12[%c0_76, %c0_77, %c0_78] : memref<2x1x32xf32, #tpu.memory_space<vmem>>, vector<1x1x32xf32>
    %169 = vector.shape_cast %168 : vector<1x1x32xf32> to vector<1x32xf32>
    %c0_79 = arith.constant 0 : index
    %c0_80 = arith.constant 0 : index
    %c0_81 = arith.constant 0 : index
    %170 = vector.load %arg13[%c0_79, %c0_80, %c0_81] : memref<2x1x32xf32, #tpu.memory_space<vmem>>, vector<1x1x32xf32>
    %171 = vector.shape_cast %170 : vector<1x1x32xf32> to vector<1x32xf32>
    %cst_82 = arith.constant dense<0.000000e+00> : vector<16xf32>
    %172 = vector.multi_reduction <add>, %167, %cst_82 [1] : vector<16x32xf32> to vector<16xf32>
    %173 = vector.shape_cast %172 : vector<16xf32> to vector<16x1xf32>
    %cst_83 = arith.constant 3.200000e+01 : f32
    %174 = vector.broadcast %cst_83 : f32 to vector<16x1xf32>
    %175 = arith.divf %173, %174 : vector<16x1xf32>
    %176 = vector.broadcast %175 : vector<16x1xf32> to vector<16x32xf32>
    %177 = arith.subf %167, %176 : vector<16x32xf32>
    %178 = arith.mulf %177, %177 : vector<16x32xf32>
    %cst_84 = arith.constant dense<0.000000e+00> : vector<16xf32>
    %179 = vector.multi_reduction <add>, %178, %cst_84 [1] : vector<16x32xf32> to vector<16xf32>
    %180 = vector.shape_cast %179 : vector<16xf32> to vector<16x1xf32>
    %cst_85 = arith.constant 3.200000e+01 : f32
    %181 = vector.broadcast %cst_85 : f32 to vector<16x1xf32>
    %182 = arith.divf %180, %181 : vector<16x1xf32>
    %cst_86 = arith.constant 9.99999974E-6 : f32
    %183 = vector.broadcast %cst_86 : f32 to vector<16x1xf32>
    %184 = arith.addf %182, %183 : vector<16x1xf32>
    %185 = math.rsqrt %184 : vector<16x1xf32>
    %186 = vector.broadcast %185 : vector<16x1xf32> to vector<16x32xf32>
    %187 = arith.mulf %177, %186 : vector<16x32xf32>
    %188 = vector.broadcast %169 : vector<1x32xf32> to vector<16x32xf32>
    %189 = arith.mulf %187, %188 : vector<16x32xf32>
    %190 = vector.broadcast %171 : vector<1x32xf32> to vector<16x32xf32>
    %191 = arith.addf %189, %190 : vector<16x32xf32>
    %c0_87 = arith.constant 0 : index
    %c0_88 = arith.constant 0 : index
    %c0_89 = arith.constant 0 : index
    %192 = vector.load %arg8[%c0_87, %c0_88, %c0_89] : memref<2x32x64xf32, #tpu.memory_space<vmem>>, vector<1x32x64xf32>
    %193 = vector.shape_cast %192 : vector<1x32x64xf32> to vector<32x64xf32>
    %cst_90 = arith.constant dense<0.000000e+00> : vector<16x64xf32>
    %194 = tpu.matmul %191, %193, %cst_90 {dimension_numbers = #tpu.dot_dimension_numbers<[1], [0], [0], [1], [0, 0, 1, 1], [], []>} : vector<16x32xf32>, vector<32x64xf32>, vector<16x64xf32> -> vector<16x64xf32>
    %c0_91 = arith.constant 0 : index
    %c0_92 = arith.constant 0 : index
    %c0_93 = arith.constant 0 : index
    %195 = vector.load %arg9[%c0_91, %c0_92, %c0_93] : memref<2x1x64xf32, #tpu.memory_space<vmem>>, vector<1x1x64xf32>
    %196 = vector.shape_cast %195 : vector<1x1x64xf32> to vector<1x64xf32>
    %197 = vector.broadcast %196 : vector<1x64xf32> to vector<16x64xf32>
    %198 = arith.addf %194, %197 : vector<16x64xf32>
    %cst_94 = arith.constant 0.000000e+00 : f32
    %199 = vector.broadcast %cst_94 : f32 to vector<16x64xf32>
    %200 = arith.maximumf %198, %199 : vector<16x64xf32>
    %c0_95 = arith.constant 0 : index
    %c0_96 = arith.constant 0 : index
    %c0_97 = arith.constant 0 : index
    %201 = vector.load %arg10[%c0_95, %c0_96, %c0_97] : memref<2x64x32xf32, #tpu.memory_space<vmem>>, vector<1x64x32xf32>
    %202 = vector.shape_cast %201 : vector<1x64x32xf32> to vector<64x32xf32>
    %cst_98 = arith.constant dense<0.000000e+00> : vector<16x32xf32>
    %203 = tpu.matmul %200, %202, %cst_98 {dimension_numbers = #tpu.dot_dimension_numbers<[1], [0], [0], [1], [0, 0, 1, 1], [], []>} : vector<16x64xf32>, vector<64x32xf32>, vector<16x32xf32> -> vector<16x32xf32>
    %c0_99 = arith.constant 0 : index
    %c0_100 = arith.constant 0 : index
    %c0_101 = arith.constant 0 : index
    %204 = vector.load %arg11[%c0_99, %c0_100, %c0_101] : memref<2x1x32xf32, #tpu.memory_space<vmem>>, vector<1x1x32xf32>
    %205 = vector.shape_cast %204 : vector<1x1x32xf32> to vector<1x32xf32>
    %206 = vector.broadcast %205 : vector<1x32xf32> to vector<16x32xf32>
    %207 = arith.addf %203, %206 : vector<16x32xf32>
    %208 = arith.addf %191, %207 : vector<16x32xf32>
    %c0_102 = arith.constant 0 : index
    %c0_103 = arith.constant 0 : index
    %c0_104 = arith.constant 0 : index
    %209 = vector.load %arg14[%c0_102, %c0_103, %c0_104] : memref<2x1x32xf32, #tpu.memory_space<vmem>>, vector<1x1x32xf32>
    %210 = vector.shape_cast %209 : vector<1x1x32xf32> to vector<1x32xf32>
    %c0_105 = arith.constant 0 : index
    %c0_106 = arith.constant 0 : index
    %c0_107 = arith.constant 0 : index
    %211 = vector.load %arg15[%c0_105, %c0_106, %c0_107] : memref<2x1x32xf32, #tpu.memory_space<vmem>>, vector<1x1x32xf32>
    %212 = vector.shape_cast %211 : vector<1x1x32xf32> to vector<1x32xf32>
    %cst_108 = arith.constant dense<0.000000e+00> : vector<16xf32>
    %213 = vector.multi_reduction <add>, %208, %cst_108 [1] : vector<16x32xf32> to vector<16xf32>
    %214 = vector.shape_cast %213 : vector<16xf32> to vector<16x1xf32>
    %cst_109 = arith.constant 3.200000e+01 : f32
    %215 = vector.broadcast %cst_109 : f32 to vector<16x1xf32>
    %216 = arith.divf %214, %215 : vector<16x1xf32>
    %217 = vector.broadcast %216 : vector<16x1xf32> to vector<16x32xf32>
    %218 = arith.subf %208, %217 : vector<16x32xf32>
    %219 = arith.mulf %218, %218 : vector<16x32xf32>
    %cst_110 = arith.constant dense<0.000000e+00> : vector<16xf32>
    %220 = vector.multi_reduction <add>, %219, %cst_110 [1] : vector<16x32xf32> to vector<16xf32>
    %221 = vector.shape_cast %220 : vector<16xf32> to vector<16x1xf32>
    %cst_111 = arith.constant 3.200000e+01 : f32
    %222 = vector.broadcast %cst_111 : f32 to vector<16x1xf32>
    %223 = arith.divf %221, %222 : vector<16x1xf32>
    %cst_112 = arith.constant 9.99999974E-6 : f32
    %224 = vector.broadcast %cst_112 : f32 to vector<16x1xf32>
    %225 = arith.addf %223, %224 : vector<16x1xf32>
    %226 = math.rsqrt %225 : vector<16x1xf32>
    %227 = vector.broadcast %226 : vector<16x1xf32> to vector<16x32xf32>
    %228 = arith.mulf %218, %227 : vector<16x32xf32>
    %229 = vector.broadcast %210 : vector<1x32xf32> to vector<16x32xf32>
    %230 = arith.mulf %228, %229 : vector<16x32xf32>
    %231 = vector.broadcast %212 : vector<1x32xf32> to vector<16x32xf32>
    %232 = arith.addf %230, %231 : vector<16x32xf32>
    %c1 = arith.constant 1 : index
    %c0_113 = arith.constant 0 : index
    %c0_114 = arith.constant 0 : index
    %233 = vector.load %arg4[%c1, %c0_113, %c0_114] : memref<2x32x96xf32, #tpu.memory_space<vmem>>, vector<1x32x96xf32>
    %234 = vector.shape_cast %233 : vector<1x32x96xf32> to vector<32x96xf32>
    %cst_115 = arith.constant dense<0.000000e+00> : vector<16x96xf32>
    %235 = tpu.matmul %232, %234, %cst_115 {dimension_numbers = #tpu.dot_dimension_numbers<[1], [0], [0], [1], [0, 0, 1, 1], [], []>} : vector<16x32xf32>, vector<32x96xf32>, vector<16x96xf32> -> vector<16x96xf32>
    %c1_116 = arith.constant 1 : index
    %c0_117 = arith.constant 0 : index
    %c0_118 = arith.constant 0 : index
    %236 = vector.load %arg5[%c1_116, %c0_117, %c0_118] : memref<2x1x96xf32, #tpu.memory_space<vmem>>, vector<1x1x96xf32>
    %237 = vector.shape_cast %236 : vector<1x1x96xf32> to vector<1x96xf32>
    %238 = vector.broadcast %237 : vector<1x96xf32> to vector<16x96xf32>
    %239 = arith.addf %235, %238 : vector<16x96xf32>
    %240 = vector.extract_strided_slice %239 {offsets = [0, 0], sizes = [8, 8], strides = [1, 1]} : vector<16x96xf32> to vector<8x8xf32>
    %241 = vector.extract_strided_slice %239 {offsets = [0, 32], sizes = [8, 8], strides = [1, 1]} : vector<16x96xf32> to vector<8x8xf32>
    %242 = vector.extract_strided_slice %239 {offsets = [0, 64], sizes = [8, 8], strides = [1, 1]} : vector<16x96xf32> to vector<8x8xf32>
    %cst_119 = arith.constant dense<0.000000e+00> : vector<8x8xf32>
    %243 = tpu.matmul %240, %241, %cst_119 {dimension_numbers = #tpu.dot_dimension_numbers<[1], [1], [0], [0], [0, 0, 1, 0], [], []>} : vector<8x8xf32>, vector<8x8xf32>, vector<8x8xf32> -> vector<8x8xf32>
    %cst_120 = arith.constant 0.353553385 : f32
    %244 = vector.broadcast %cst_120 : f32 to vector<8x8xf32>
    %245 = arith.mulf %243, %244 : vector<8x8xf32>
    %cst_121 = arith.constant dense<0xFF800000> : vector<8xf32>
    %246 = vector.multi_reduction <maximumf>, %245, %cst_121 [1] : vector<8x8xf32> to vector<8xf32>
    %247 = vector.shape_cast %246 : vector<8xf32> to vector<8x1xf32>
    %248 = vector.broadcast %247 : vector<8x1xf32> to vector<8x8xf32>
    %249 = arith.subf %245, %248 : vector<8x8xf32>
    %250 = math.exp %249 : vector<8x8xf32>
    %cst_122 = arith.constant dense<0.000000e+00> : vector<8xf32>
    %251 = vector.multi_reduction <add>, %250, %cst_122 [1] : vector<8x8xf32> to vector<8xf32>
    %252 = vector.shape_cast %251 : vector<8xf32> to vector<8x1xf32>
    %253 = tpu.reciprocal %252 {approx = true} : vector<8x1xf32> -> vector<8x1xf32>
    %254 = vector.broadcast %253 : vector<8x1xf32> to vector<8x8xf32>
    %255 = arith.mulf %250, %254 : vector<8x8xf32>
    %cst_123 = arith.constant dense<0.000000e+00> : vector<8x8xf32>
    %256 = tpu.matmul %255, %242, %cst_123 {dimension_numbers = #tpu.dot_dimension_numbers<[1], [0], [0], [1], [0, 0, 1, 1], [], []>} : vector<8x8xf32>, vector<8x8xf32>, vector<8x8xf32> -> vector<8x8xf32>
    %c0_124 = arith.constant 0 : index
    %c0_125 = arith.constant 0 : index
    %257 = vector.load %arg17[%c0_124, %c0_125] : memref<16x32xf32, #tpu.memory_space<vmem>>, vector<8x8xf32>
    tpu.vector_store %arg17[%c0_124, %c0_125], %256 {strides = array<i32>} : memref<16x32xf32, #tpu.memory_space<vmem>>, vector<8x8xf32>,
    %258 = vector.extract_strided_slice %239 {offsets = [0, 8], sizes = [8, 8], strides = [1, 1]} : vector<16x96xf32> to vector<8x8xf32>
    %259 = vector.extract_strided_slice %239 {offsets = [0, 40], sizes = [8, 8], strides = [1, 1]} : vector<16x96xf32> to vector<8x8xf32>
    %260 = vector.extract_strided_slice %239 {offsets = [0, 72], sizes = [8, 8], strides = [1, 1]} : vector<16x96xf32> to vector<8x8xf32>
    %cst_126 = arith.constant dense<0.000000e+00> : vector<8x8xf32>
    %261 = tpu.matmul %258, %259, %cst_126 {dimension_numbers = #tpu.dot_dimension_numbers<[1], [1], [0], [0], [0, 0, 1, 0], [], []>} : vector<8x8xf32>, vector<8x8xf32>, vector<8x8xf32> -> vector<8x8xf32>
    %cst_127 = arith.constant 0.353553385 : f32
    %262 = vector.broadcast %cst_127 : f32 to vector<8x8xf32>
    %263 = arith.mulf %261, %262 : vector<8x8xf32>
    %cst_128 = arith.constant dense<0xFF800000> : vector<8xf32>
    %264 = vector.multi_reduction <maximumf>, %263, %cst_128 [1] : vector<8x8xf32> to vector<8xf32>
    %265 = vector.shape_cast %264 : vector<8xf32> to vector<8x1xf32>
    %266 = vector.broadcast %265 : vector<8x1xf32> to vector<8x8xf32>
    %267 = arith.subf %263, %266 : vector<8x8xf32>
    %268 = math.exp %267 : vector<8x8xf32>
    %cst_129 = arith.constant dense<0.000000e+00> : vector<8xf32>
    %269 = vector.multi_reduction <add>, %268, %cst_129 [1] : vector<8x8xf32> to vector<8xf32>
    %270 = vector.shape_cast %269 : vector<8xf32> to vector<8x1xf32>
    %271 = tpu.reciprocal %270 {approx = true} : vector<8x1xf32> -> vector<8x1xf32>
    %272 = vector.broadcast %271 : vector<8x1xf32> to vector<8x8xf32>
    %273 = arith.mulf %268, %272 : vector<8x8xf32>
    %cst_130 = arith.constant dense<0.000000e+00> : vector<8x8xf32>
    %274 = tpu.matmul %273, %260, %cst_130 {dimension_numbers = #tpu.dot_dimension_numbers<[1], [0], [0], [1], [0, 0, 1, 1], [], []>} : vector<8x8xf32>, vector<8x8xf32>, vector<8x8xf32> -> vector<8x8xf32>
    %c0_131 = arith.constant 0 : index
    %c8_132 = arith.constant 8 : index
    %275 = vector.load %arg17[%c0_131, %c8_132] : memref<16x32xf32, #tpu.memory_space<vmem>>, vector<8x8xf32>
    tpu.vector_store %arg17[%c0_131, %c8_132], %274 {strides = array<i32>} : memref<16x32xf32, #tpu.memory_space<vmem>>, vector<8x8xf32>,
    %276 = vector.extract_strided_slice %239 {offsets = [0, 16], sizes = [8, 8], strides = [1, 1]} : vector<16x96xf32> to vector<8x8xf32>
    %277 = vector.extract_strided_slice %239 {offsets = [0, 48], sizes = [8, 8], strides = [1, 1]} : vector<16x96xf32> to vector<8x8xf32>
    %278 = vector.extract_strided_slice %239 {offsets = [0, 80], sizes = [8, 8], strides = [1, 1]} : vector<16x96xf32> to vector<8x8xf32>
    %cst_133 = arith.constant dense<0.000000e+00> : vector<8x8xf32>
    %279 = tpu.matmul %276, %277, %cst_133 {dimension_numbers = #tpu.dot_dimension_numbers<[1], [1], [0], [0], [0, 0, 1, 0], [], []>} : vector<8x8xf32>, vector<8x8xf32>, vector<8x8xf32> -> vector<8x8xf32>
    %cst_134 = arith.constant 0.353553385 : f32
    %280 = vector.broadcast %cst_134 : f32 to vector<8x8xf32>
    %281 = arith.mulf %279, %280 : vector<8x8xf32>
    %cst_135 = arith.constant dense<0xFF800000> : vector<8xf32>
    %282 = vector.multi_reduction <maximumf>, %281, %cst_135 [1] : vector<8x8xf32> to vector<8xf32>
    %283 = vector.shape_cast %282 : vector<8xf32> to vector<8x1xf32>
    %284 = vector.broadcast %283 : vector<8x1xf32> to vector<8x8xf32>
    %285 = arith.subf %281, %284 : vector<8x8xf32>
    %286 = math.exp %285 : vector<8x8xf32>
    %cst_136 = arith.constant dense<0.000000e+00> : vector<8xf32>
    %287 = vector.multi_reduction <add>, %286, %cst_136 [1] : vector<8x8xf32> to vector<8xf32>
    %288 = vector.shape_cast %287 : vector<8xf32> to vector<8x1xf32>
    %289 = tpu.reciprocal %288 {approx = true} : vector<8x1xf32> -> vector<8x1xf32>
    %290 = vector.broadcast %289 : vector<8x1xf32> to vector<8x8xf32>
    %291 = arith.mulf %286, %290 : vector<8x8xf32>
    %cst_137 = arith.constant dense<0.000000e+00> : vector<8x8xf32>
    %292 = tpu.matmul %291, %278, %cst_137 {dimension_numbers = #tpu.dot_dimension_numbers<[1], [0], [0], [1], [0, 0, 1, 1], [], []>} : vector<8x8xf32>, vector<8x8xf32>, vector<8x8xf32> -> vector<8x8xf32>
    %c0_138 = arith.constant 0 : index
    %c16_139 = arith.constant 16 : index
    %293 = vector.load %arg17[%c0_138, %c16_139] : memref<16x32xf32, #tpu.memory_space<vmem>>, vector<8x8xf32>
    tpu.vector_store %arg17[%c0_138, %c16_139], %292 {strides = array<i32>} : memref<16x32xf32, #tpu.memory_space<vmem>>, vector<8x8xf32>,
    %294 = vector.extract_strided_slice %239 {offsets = [0, 24], sizes = [8, 8], strides = [1, 1]} : vector<16x96xf32> to vector<8x8xf32>
    %295 = vector.extract_strided_slice %239 {offsets = [0, 56], sizes = [8, 8], strides = [1, 1]} : vector<16x96xf32> to vector<8x8xf32>
    %296 = vector.extract_strided_slice %239 {offsets = [0, 88], sizes = [8, 8], strides = [1, 1]} : vector<16x96xf32> to vector<8x8xf32>
    %cst_140 = arith.constant dense<0.000000e+00> : vector<8x8xf32>
    %297 = tpu.matmul %294, %295, %cst_140 {dimension_numbers = #tpu.dot_dimension_numbers<[1], [1], [0], [0], [0, 0, 1, 0], [], []>} : vector<8x8xf32>, vector<8x8xf32>, vector<8x8xf32> -> vector<8x8xf32>
    %cst_141 = arith.constant 0.353553385 : f32
    %298 = vector.broadcast %cst_141 : f32 to vector<8x8xf32>
    %299 = arith.mulf %297, %298 : vector<8x8xf32>
    %cst_142 = arith.constant dense<0xFF800000> : vector<8xf32>
    %300 = vector.multi_reduction <maximumf>, %299, %cst_142 [1] : vector<8x8xf32> to vector<8xf32>
    %301 = vector.shape_cast %300 : vector<8xf32> to vector<8x1xf32>
    %302 = vector.broadcast %301 : vector<8x1xf32> to vector<8x8xf32>
    %303 = arith.subf %299, %302 : vector<8x8xf32>
    %304 = math.exp %303 : vector<8x8xf32>
    %cst_143 = arith.constant dense<0.000000e+00> : vector<8xf32>
    %305 = vector.multi_reduction <add>, %304, %cst_143 [1] : vector<8x8xf32> to vector<8xf32>
    %306 = vector.shape_cast %305 : vector<8xf32> to vector<8x1xf32>
    %307 = tpu.reciprocal %306 {approx = true} : vector<8x1xf32> -> vector<8x1xf32>
    %308 = vector.broadcast %307 : vector<8x1xf32> to vector<8x8xf32>
    %309 = arith.mulf %304, %308 : vector<8x8xf32>
    %cst_144 = arith.constant dense<0.000000e+00> : vector<8x8xf32>
    %310 = tpu.matmul %309, %296, %cst_144 {dimension_numbers = #tpu.dot_dimension_numbers<[1], [0], [0], [1], [0, 0, 1, 1], [], []>} : vector<8x8xf32>, vector<8x8xf32>, vector<8x8xf32> -> vector<8x8xf32>
    %c0_145 = arith.constant 0 : index
    %c24_146 = arith.constant 24 : index
    %311 = vector.load %arg17[%c0_145, %c24_146] : memref<16x32xf32, #tpu.memory_space<vmem>>, vector<8x8xf32>
    tpu.vector_store %arg17[%c0_145, %c24_146], %310 {strides = array<i32>} : memref<16x32xf32, #tpu.memory_space<vmem>>, vector<8x8xf32>,
    %312 = vector.extract_strided_slice %239 {offsets = [8, 0], sizes = [8, 8], strides = [1, 1]} : vector<16x96xf32> to vector<8x8xf32>
    %313 = vector.extract_strided_slice %239 {offsets = [8, 32], sizes = [8, 8], strides = [1, 1]} : vector<16x96xf32> to vector<8x8xf32>
    %314 = vector.extract_strided_slice %239 {offsets = [8, 64], sizes = [8, 8], strides = [1, 1]} : vector<16x96xf32> to vector<8x8xf32>
    %cst_147 = arith.constant dense<0.000000e+00> : vector<8x8xf32>
    %315 = tpu.matmul %312, %313, %cst_147 {dimension_numbers = #tpu.dot_dimension_numbers<[1], [1], [0], [0], [0, 0, 1, 0], [], []>} : vector<8x8xf32>, vector<8x8xf32>, vector<8x8xf32> -> vector<8x8xf32>
    %cst_148 = arith.constant 0.353553385 : f32
    %316 = vector.broadcast %cst_148 : f32 to vector<8x8xf32>
    %317 = arith.mulf %315, %316 : vector<8x8xf32>
    %cst_149 = arith.constant dense<0xFF800000> : vector<8xf32>
    %318 = vector.multi_reduction <maximumf>, %317, %cst_149 [1] : vector<8x8xf32> to vector<8xf32>
    %319 = vector.shape_cast %318 : vector<8xf32> to vector<8x1xf32>
    %320 = vector.broadcast %319 : vector<8x1xf32> to vector<8x8xf32>
    %321 = arith.subf %317, %320 : vector<8x8xf32>
    %322 = math.exp %321 : vector<8x8xf32>
    %cst_150 = arith.constant dense<0.000000e+00> : vector<8xf32>
    %323 = vector.multi_reduction <add>, %322, %cst_150 [1] : vector<8x8xf32> to vector<8xf32>
    %324 = vector.shape_cast %323 : vector<8xf32> to vector<8x1xf32>
    %325 = tpu.reciprocal %324 {approx = true} : vector<8x1xf32> -> vector<8x1xf32>
    %326 = vector.broadcast %325 : vector<8x1xf32> to vector<8x8xf32>
    %327 = arith.mulf %322, %326 : vector<8x8xf32>
    %cst_151 = arith.constant dense<0.000000e+00> : vector<8x8xf32>
    %328 = tpu.matmul %327, %314, %cst_151 {dimension_numbers = #tpu.dot_dimension_numbers<[1], [0], [0], [1], [0, 0, 1, 1], [], []>} : vector<8x8xf32>, vector<8x8xf32>, vector<8x8xf32> -> vector<8x8xf32>
    %c8_152 = arith.constant 8 : index
    %c0_153 = arith.constant 0 : index
    %329 = vector.load %arg17[%c8_152, %c0_153] : memref<16x32xf32, #tpu.memory_space<vmem>>, vector<8x8xf32>
    tpu.vector_store %arg17[%c8_152, %c0_153], %328 {strides = array<i32>} : memref<16x32xf32, #tpu.memory_space<vmem>>, vector<8x8xf32>,
    %330 = vector.extract_strided_slice %239 {offsets = [8, 8], sizes = [8, 8], strides = [1, 1]} : vector<16x96xf32> to vector<8x8xf32>
    %331 = vector.extract_strided_slice %239 {offsets = [8, 40], sizes = [8, 8], strides = [1, 1]} : vector<16x96xf32> to vector<8x8xf32>
    %332 = vector.extract_strided_slice %239 {offsets = [8, 72], sizes = [8, 8], strides = [1, 1]} : vector<16x96xf32> to vector<8x8xf32>
    %cst_154 = arith.constant dense<0.000000e+00> : vector<8x8xf32>
    %333 = tpu.matmul %330, %331, %cst_154 {dimension_numbers = #tpu.dot_dimension_numbers<[1], [1], [0], [0], [0, 0, 1, 0], [], []>} : vector<8x8xf32>, vector<8x8xf32>, vector<8x8xf32> -> vector<8x8xf32>
    %cst_155 = arith.constant 0.353553385 : f32
    %334 = vector.broadcast %cst_155 : f32 to vector<8x8xf32>
    %335 = arith.mulf %333, %334 : vector<8x8xf32>
    %cst_156 = arith.constant dense<0xFF800000> : vector<8xf32>
    %336 = vector.multi_reduction <maximumf>, %335, %cst_156 [1] : vector<8x8xf32> to vector<8xf32>
    %337 = vector.shape_cast %336 : vector<8xf32> to vector<8x1xf32>
    %338 = vector.broadcast %337 : vector<8x1xf32> to vector<8x8xf32>
    %339 = arith.subf %335, %338 : vector<8x8xf32>
    %340 = math.exp %339 : vector<8x8xf32>
    %cst_157 = arith.constant dense<0.000000e+00> : vector<8xf32>
    %341 = vector.multi_reduction <add>, %340, %cst_157 [1] : vector<8x8xf32> to vector<8xf32>
    %342 = vector.shape_cast %341 : vector<8xf32> to vector<8x1xf32>
    %343 = tpu.reciprocal %342 {approx = true} : vector<8x1xf32> -> vector<8x1xf32>
    %344 = vector.broadcast %343 : vector<8x1xf32> to vector<8x8xf32>
    %345 = arith.mulf %340, %344 : vector<8x8xf32>
    %cst_158 = arith.constant dense<0.000000e+00> : vector<8x8xf32>
    %346 = tpu.matmul %345, %332, %cst_158 {dimension_numbers = #tpu.dot_dimension_numbers<[1], [0], [0], [1], [0, 0, 1, 1], [], []>} : vector<8x8xf32>, vector<8x8xf32>, vector<8x8xf32> -> vector<8x8xf32>
    %c8_159 = arith.constant 8 : index
    %c8_160 = arith.constant 8 : index
    %347 = vector.load %arg17[%c8_159, %c8_160] : memref<16x32xf32, #tpu.memory_space<vmem>>, vector<8x8xf32>
    tpu.vector_store %arg17[%c8_159, %c8_160], %346 {strides = array<i32>} : memref<16x32xf32, #tpu.memory_space<vmem>>, vector<8x8xf32>,
    %348 = vector.extract_strided_slice %239 {offsets = [8, 16], sizes = [8, 8], strides = [1, 1]} : vector<16x96xf32> to vector<8x8xf32>
    %349 = vector.extract_strided_slice %239 {offsets = [8, 48], sizes = [8, 8], strides = [1, 1]} : vector<16x96xf32> to vector<8x8xf32>
    %350 = vector.extract_strided_slice %239 {offsets = [8, 80], sizes = [8, 8], strides = [1, 1]} : vector<16x96xf32> to vector<8x8xf32>
    %cst_161 = arith.constant dense<0.000000e+00> : vector<8x8xf32>
    %351 = tpu.matmul %348, %349, %cst_161 {dimension_numbers = #tpu.dot_dimension_numbers<[1], [1], [0], [0], [0, 0, 1, 0], [], []>} : vector<8x8xf32>, vector<8x8xf32>, vector<8x8xf32> -> vector<8x8xf32>
    %cst_162 = arith.constant 0.353553385 : f32
    %352 = vector.broadcast %cst_162 : f32 to vector<8x8xf32>
    %353 = arith.mulf %351, %352 : vector<8x8xf32>
    %cst_163 = arith.constant dense<0xFF800000> : vector<8xf32>
    %354 = vector.multi_reduction <maximumf>, %353, %cst_163 [1] : vector<8x8xf32> to vector<8xf32>
    %355 = vector.shape_cast %354 : vector<8xf32> to vector<8x1xf32>
    %356 = vector.broadcast %355 : vector<8x1xf32> to vector<8x8xf32>
    %357 = arith.subf %353, %356 : vector<8x8xf32>
    %358 = math.exp %357 : vector<8x8xf32>
    %cst_164 = arith.constant dense<0.000000e+00> : vector<8xf32>
    %359 = vector.multi_reduction <add>, %358, %cst_164 [1] : vector<8x8xf32> to vector<8xf32>
    %360 = vector.shape_cast %359 : vector<8xf32> to vector<8x1xf32>
    %361 = tpu.reciprocal %360 {approx = true} : vector<8x1xf32> -> vector<8x1xf32>
    %362 = vector.broadcast %361 : vector<8x1xf32> to vector<8x8xf32>
    %363 = arith.mulf %358, %362 : vector<8x8xf32>
    %cst_165 = arith.constant dense<0.000000e+00> : vector<8x8xf32>
    %364 = tpu.matmul %363, %350, %cst_165 {dimension_numbers = #tpu.dot_dimension_numbers<[1], [0], [0], [1], [0, 0, 1, 1], [], []>} : vector<8x8xf32>, vector<8x8xf32>, vector<8x8xf32> -> vector<8x8xf32>
    %c8_166 = arith.constant 8 : index
    %c16_167 = arith.constant 16 : index
    %365 = vector.load %arg17[%c8_166, %c16_167] : memref<16x32xf32, #tpu.memory_space<vmem>>, vector<8x8xf32>
    tpu.vector_store %arg17[%c8_166, %c16_167], %364 {strides = array<i32>} : memref<16x32xf32, #tpu.memory_space<vmem>>, vector<8x8xf32>,
    %366 = vector.extract_strided_slice %239 {offsets = [8, 24], sizes = [8, 8], strides = [1, 1]} : vector<16x96xf32> to vector<8x8xf32>
    %367 = vector.extract_strided_slice %239 {offsets = [8, 56], sizes = [8, 8], strides = [1, 1]} : vector<16x96xf32> to vector<8x8xf32>
    %368 = vector.extract_strided_slice %239 {offsets = [8, 88], sizes = [8, 8], strides = [1, 1]} : vector<16x96xf32> to vector<8x8xf32>
    %cst_168 = arith.constant dense<0.000000e+00> : vector<8x8xf32>
    %369 = tpu.matmul %366, %367, %cst_168 {dimension_numbers = #tpu.dot_dimension_numbers<[1], [1], [0], [0], [0, 0, 1, 0], [], []>} : vector<8x8xf32>, vector<8x8xf32>, vector<8x8xf32> -> vector<8x8xf32>
    %cst_169 = arith.constant 0.353553385 : f32
    %370 = vector.broadcast %cst_169 : f32 to vector<8x8xf32>
    %371 = arith.mulf %369, %370 : vector<8x8xf32>
    %cst_170 = arith.constant dense<0xFF800000> : vector<8xf32>
    %372 = vector.multi_reduction <maximumf>, %371, %cst_170 [1] : vector<8x8xf32> to vector<8xf32>
    %373 = vector.shape_cast %372 : vector<8xf32> to vector<8x1xf32>
    %374 = vector.broadcast %373 : vector<8x1xf32> to vector<8x8xf32>
    %375 = arith.subf %371, %374 : vector<8x8xf32>
    %376 = math.exp %375 : vector<8x8xf32>
    %cst_171 = arith.constant dense<0.000000e+00> : vector<8xf32>
    %377 = vector.multi_reduction <add>, %376, %cst_171 [1] : vector<8x8xf32> to vector<8xf32>
    %378 = vector.shape_cast %377 : vector<8xf32> to vector<8x1xf32>
    %379 = tpu.reciprocal %378 {approx = true} : vector<8x1xf32> -> vector<8x1xf32>
    %380 = vector.broadcast %379 : vector<8x1xf32> to vector<8x8xf32>
    %381 = arith.mulf %376, %380 : vector<8x8xf32>
    %cst_172 = arith.constant dense<0.000000e+00> : vector<8x8xf32>
    %382 = tpu.matmul %381, %368, %cst_172 {dimension_numbers = #tpu.dot_dimension_numbers<[1], [0], [0], [1], [0, 0, 1, 1], [], []>} : vector<8x8xf32>, vector<8x8xf32>, vector<8x8xf32> -> vector<8x8xf32>
    %c8_173 = arith.constant 8 : index
    %c24_174 = arith.constant 24 : index
    %383 = vector.load %arg17[%c8_173, %c24_174] : memref<16x32xf32, #tpu.memory_space<vmem>>, vector<8x8xf32>
    tpu.vector_store %arg17[%c8_173, %c24_174], %382 {strides = array<i32>} : memref<16x32xf32, #tpu.memory_space<vmem>>, vector<8x8xf32>,
    %c0_175 = arith.constant 0 : index
    %c0_176 = arith.constant 0 : index
    %384 = vector.load %arg17[%c0_175, %c0_176] : memref<16x32xf32, #tpu.memory_space<vmem>>, vector<16x32xf32>
    %c1_177 = arith.constant 1 : index
    %c0_178 = arith.constant 0 : index
    %c0_179 = arith.constant 0 : index
    %385 = vector.load %arg6[%c1_177, %c0_178, %c0_179] : memref<2x32x32xf32, #tpu.memory_space<vmem>>, vector<1x32x32xf32>
    %386 = vector.shape_cast %385 : vector<1x32x32xf32> to vector<32x32xf32>
    %cst_180 = arith.constant dense<0.000000e+00> : vector<16x32xf32>
    %387 = tpu.matmul %384, %386, %cst_180 {dimension_numbers = #tpu.dot_dimension_numbers<[1], [0], [0], [1], [0, 0, 1, 1], [], []>} : vector<16x32xf32>, vector<32x32xf32>, vector<16x32xf32> -> vector<16x32xf32>
    %c1_181 = arith.constant 1 : index
    %c0_182 = arith.constant 0 : index
    %c0_183 = arith.constant 0 : index
    %388 = vector.load %arg7[%c1_181, %c0_182, %c0_183] : memref<2x1x32xf32, #tpu.memory_space<vmem>>, vector<1x1x32xf32>
    %389 = vector.shape_cast %388 : vector<1x1x32xf32> to vector<1x32xf32>
    %390 = vector.broadcast %389 : vector<1x32xf32> to vector<16x32xf32>
    %391 = arith.addf %387, %390 : vector<16x32xf32>
    %392 = arith.addf %232, %391 : vector<16x32xf32>
    %c1_184 = arith.constant 1 : index
    %c0_185 = arith.constant 0 : index
    %c0_186 = arith.constant 0 : index
    %393 = vector.load %arg12[%c1_184, %c0_185, %c0_186] : memref<2x1x32xf32, #tpu.memory_space<vmem>>, vector<1x1x32xf32>
    %394 = vector.shape_cast %393 : vector<1x1x32xf32> to vector<1x32xf32>
    %c1_187 = arith.constant 1 : index
    %c0_188 = arith.constant 0 : index
    %c0_189 = arith.constant 0 : index
    %395 = vector.load %arg13[%c1_187, %c0_188, %c0_189] : memref<2x1x32xf32, #tpu.memory_space<vmem>>, vector<1x1x32xf32>
    %396 = vector.shape_cast %395 : vector<1x1x32xf32> to vector<1x32xf32>
    %cst_190 = arith.constant dense<0.000000e+00> : vector<16xf32>
    %397 = vector.multi_reduction <add>, %392, %cst_190 [1] : vector<16x32xf32> to vector<16xf32>
    %398 = vector.shape_cast %397 : vector<16xf32> to vector<16x1xf32>
    %cst_191 = arith.constant 3.200000e+01 : f32
    %399 = vector.broadcast %cst_191 : f32 to vector<16x1xf32>
    %400 = arith.divf %398, %399 : vector<16x1xf32>
    %401 = vector.broadcast %400 : vector<16x1xf32> to vector<16x32xf32>
    %402 = arith.subf %392, %401 : vector<16x32xf32>
    %403 = arith.mulf %402, %402 : vector<16x32xf32>
    %cst_192 = arith.constant dense<0.000000e+00> : vector<16xf32>
    %404 = vector.multi_reduction <add>, %403, %cst_192 [1] : vector<16x32xf32> to vector<16xf32>
    %405 = vector.shape_cast %404 : vector<16xf32> to vector<16x1xf32>
    %cst_193 = arith.constant 3.200000e+01 : f32
    %406 = vector.broadcast %cst_193 : f32 to vector<16x1xf32>
    %407 = arith.divf %405, %406 : vector<16x1xf32>
    %cst_194 = arith.constant 9.99999974E-6 : f32
    %408 = vector.broadcast %cst_194 : f32 to vector<16x1xf32>
    %409 = arith.addf %407, %408 : vector<16x1xf32>
    %410 = math.rsqrt %409 : vector<16x1xf32>
    %411 = vector.broadcast %410 : vector<16x1xf32> to vector<16x32xf32>
    %412 = arith.mulf %402, %411 : vector<16x32xf32>
    %413 = vector.broadcast %394 : vector<1x32xf32> to vector<16x32xf32>
    %414 = arith.mulf %412, %413 : vector<16x32xf32>
    %415 = vector.broadcast %396 : vector<1x32xf32> to vector<16x32xf32>
    %416 = arith.addf %414, %415 : vector<16x32xf32>
    %c1_195 = arith.constant 1 : index
    %c0_196 = arith.constant 0 : index
    %c0_197 = arith.constant 0 : index
    %417 = vector.load %arg8[%c1_195, %c0_196, %c0_197] : memref<2x32x64xf32, #tpu.memory_space<vmem>>, vector<1x32x64xf32>
    %418 = vector.shape_cast %417 : vector<1x32x64xf32> to vector<32x64xf32>
    %cst_198 = arith.constant dense<0.000000e+00> : vector<16x64xf32>
    %419 = tpu.matmul %416, %418, %cst_198 {dimension_numbers = #tpu.dot_dimension_numbers<[1], [0], [0], [1], [0, 0, 1, 1], [], []>} : vector<16x32xf32>, vector<32x64xf32>, vector<16x64xf32> -> vector<16x64xf32>
    %c1_199 = arith.constant 1 : index
    %c0_200 = arith.constant 0 : index
    %c0_201 = arith.constant 0 : index
    %420 = vector.load %arg9[%c1_199, %c0_200, %c0_201] : memref<2x1x64xf32, #tpu.memory_space<vmem>>, vector<1x1x64xf32>
    %421 = vector.shape_cast %420 : vector<1x1x64xf32> to vector<1x64xf32>
    %422 = vector.broadcast %421 : vector<1x64xf32> to vector<16x64xf32>
    %423 = arith.addf %419, %422 : vector<16x64xf32>
    %cst_202 = arith.constant 0.000000e+00 : f32
    %424 = vector.broadcast %cst_202 : f32 to vector<16x64xf32>
    %425 = arith.maximumf %423, %424 : vector<16x64xf32>
    %c1_203 = arith.constant 1 : index
    %c0_204 = arith.constant 0 : index
    %c0_205 = arith.constant 0 : index
    %426 = vector.load %arg10[%c1_203, %c0_204, %c0_205] : memref<2x64x32xf32, #tpu.memory_space<vmem>>, vector<1x64x32xf32>
    %427 = vector.shape_cast %426 : vector<1x64x32xf32> to vector<64x32xf32>
    %cst_206 = arith.constant dense<0.000000e+00> : vector<16x32xf32>
    %428 = tpu.matmul %425, %427, %cst_206 {dimension_numbers = #tpu.dot_dimension_numbers<[1], [0], [0], [1], [0, 0, 1, 1], [], []>} : vector<16x64xf32>, vector<64x32xf32>, vector<16x32xf32> -> vector<16x32xf32>
    %c1_207 = arith.constant 1 : index
    %c0_208 = arith.constant 0 : index
    %c0_209 = arith.constant 0 : index
    %429 = vector.load %arg11[%c1_207, %c0_208, %c0_209] : memref<2x1x32xf32, #tpu.memory_space<vmem>>, vector<1x1x32xf32>
    %430 = vector.shape_cast %429 : vector<1x1x32xf32> to vector<1x32xf32>
    %431 = vector.broadcast %430 : vector<1x32xf32> to vector<16x32xf32>
    %432 = arith.addf %428, %431 : vector<16x32xf32>
    %433 = arith.addf %416, %432 : vector<16x32xf32>
    %c1_210 = arith.constant 1 : index
    %c0_211 = arith.constant 0 : index
    %c0_212 = arith.constant 0 : index
    %434 = vector.load %arg14[%c1_210, %c0_211, %c0_212] : memref<2x1x32xf32, #tpu.memory_space<vmem>>, vector<1x1x32xf32>
    %435 = vector.shape_cast %434 : vector<1x1x32xf32> to vector<1x32xf32>
    %c1_213 = arith.constant 1 : index
    %c0_214 = arith.constant 0 : index
    %c0_215 = arith.constant 0 : index
    %436 = vector.load %arg15[%c1_213, %c0_214, %c0_215] : memref<2x1x32xf32, #tpu.memory_space<vmem>>, vector<1x1x32xf32>
    %437 = vector.shape_cast %436 : vector<1x1x32xf32> to vector<1x32xf32>
    %cst_216 = arith.constant dense<0.000000e+00> : vector<16xf32>
    %438 = vector.multi_reduction <add>, %433, %cst_216 [1] : vector<16x32xf32> to vector<16xf32>
    %439 = vector.shape_cast %438 : vector<16xf32> to vector<16x1xf32>
    %cst_217 = arith.constant 3.200000e+01 : f32
    %440 = vector.broadcast %cst_217 : f32 to vector<16x1xf32>
    %441 = arith.divf %439, %440 : vector<16x1xf32>
    %442 = vector.broadcast %441 : vector<16x1xf32> to vector<16x32xf32>
    %443 = arith.subf %433, %442 : vector<16x32xf32>
    %444 = arith.mulf %443, %443 : vector<16x32xf32>
    %cst_218 = arith.constant dense<0.000000e+00> : vector<16xf32>
    %445 = vector.multi_reduction <add>, %444, %cst_218 [1] : vector<16x32xf32> to vector<16xf32>
    %446 = vector.shape_cast %445 : vector<16xf32> to vector<16x1xf32>
    %cst_219 = arith.constant 3.200000e+01 : f32
    %447 = vector.broadcast %cst_219 : f32 to vector<16x1xf32>
    %448 = arith.divf %446, %447 : vector<16x1xf32>
    %cst_220 = arith.constant 9.99999974E-6 : f32
    %449 = vector.broadcast %cst_220 : f32 to vector<16x1xf32>
    %450 = arith.addf %448, %449 : vector<16x1xf32>
    %451 = math.rsqrt %450 : vector<16x1xf32>
    %452 = vector.broadcast %451 : vector<16x1xf32> to vector<16x32xf32>
    %453 = arith.mulf %443, %452 : vector<16x32xf32>
    %454 = vector.broadcast %435 : vector<1x32xf32> to vector<16x32xf32>
    %455 = arith.mulf %453, %454 : vector<16x32xf32>
    %456 = vector.broadcast %437 : vector<1x32xf32> to vector<16x32xf32>
    %457 = arith.addf %455, %456 : vector<16x32xf32>
    %c0_221 = arith.constant 0 : index
    %c0_222 = arith.constant 0 : index
    %458 = vector.load %arg16[%c0_221, %c0_222] : memref<16x32xf32, #tpu.memory_space<vmem>>, vector<16x32xf32>
    tpu.vector_store %arg16[%c0_221, %c0_222], %457 {strides = array<i32>} : memref<16x32xf32, #tpu.memory_space<vmem>>, vector<16x32xf32>,
    return
  }
}

</mosaic_0001>

<bundles_post_ra>
// kernel: transformer_encoder_forward.1
= control target key start
LH: loop header
LB: loop body
LE: loop exit
PB: predicated region body
PF: predicated region fallthrough
CT: control target
= control target key end

     0   :  { %vm64_vm0 = vcmask 130048   ;;  %vm161_vm1 = vcmask 261120   ;;  %v4513_v20 = vmov 0.0   ;;  %vm4514_vm2 = vmmov 0   ;;  %s5210_s28 = smov 64   ;;  %s4516_s29 = smov 96   ;;  %s5186_s2 = inlined_call_operand.vmem [shape: f32[16,32], index: 2, kind: input, shape index: {}]   ;;  %s5187_s0 = inlined_call_operand.vmem [shape: f32[16,16], index: 0, kind: input, shape index: {}]   ;;  %s5188_s4 = inlined_call_operand.vmem [shape: f32[2,32,96], index: 4, kind: input, shape index: {}]   ;;  %s5189_s3 = inlined_call_operand.vmem [shape: f32[1,32], index: 3, kind: input, shape index: {}]   ;;  %s5190_s1 = inlined_call_operand.vmem [shape: f32[16,32], index: 1, kind: input, shape index: {}]   ;;  %s5191_s5 = inlined_call_operand.vmem [shape: f32[2,1,96], index: 5, kind: input, shape index: {}]   ;;  %s5192_s6 = inlined_call_operand.vmem [shape: f32[2,32,32], index: 6, kind: input, shape index: {}]   ;;  %s5193_s7 = inlined_call_operand.vmem [shape: f32[2,1,32], index: 7, kind: input, shape index: {}]   ;;  %s5194_s8 = inlined_call_operand.vmem [shape: f32[2,32,64], index: 8, kind: input, shape index: {}]   ;;  %s5195_s10 = inlined_call_operand.vmem [shape: f32[2,64,32], index: 10, kind: input, shape index: {}]   ;;  %s5196_s12 = inlined_call_operand.vmem [shape: f32[2,1,32], index: 12, kind: input, shape index: {}]   ;;  %s5197_s13 = inlined_call_operand.vmem [shape: f32[2,1,32], index: 13, kind: input, shape index: {}]   ;;  %s5198_s9 = inlined_call_operand.vmem [shape: f32[2,1,64], index: 9, kind: input, shape index: {}]   ;;  %s5199_s11 = inlined_call_operand.vmem [shape: f32[2,1,32], index: 11, kind: input, shape index: {}]   ;;  %s5200_s14 = inlined_call_operand.vmem [shape: f32[2,1,32], index: 14, kind: input, shape index: {}]   ;;  %s5201_s15 = inlined_call_operand.vmem [shape: f32[2,1,32], index: 15, kind: input, shape index: {}]   ;;  %s5202_s16 = inlined_call_operand.vmem [shape: f32[16,32], index: 16, kind: output, shape index: {}]  }
   0x1   :  { %5216 = sst [smem:[#allocation3_spill]] %s5186_s2  ;;  %v53_v2 = vld [vmem:[%s5187_s0] sm:$0xff]  ;;  %v151_v5 = vld [vmem:[%s5188_s4 + $0x8] sm:$0xff]  ;;  %v152_v8 = vld [vmem:[%s5188_s4 + $0x10] sm:$0xff]  ;;  %4085 = vmatprep.subr.mxu1 %v4513_v20  ;;  %4087 = vmatprep.mubr.msk.f32.mxu1 %vm4514_vm2, %v4513_v20  ;;  %s4517_s30 = smov 88   ;;  %vm246_vm3 = vcmask 64512  }
   0x2   :  { %s5217_s23 = sld [smem:[#allocation3_spill]]  ;;  %4066 = vmatprep.mubr.msk.f32.mxu0 %vm64_vm0, %v53_v2  ;;  %v150_v4 = vld [vmem:[%s5188_s4] sm:$0xff]  ;;  %v54_v7 = vld [vmem:[%s5187_s0 + $0x8] sm:$0xff]  ;;  %v153_v9 = vld [vmem:[%s5188_s4 + $0x18] sm:$0xff]  ;;  %s4518_s2 = smov 120   ;;  %vm580_vm4 = vcmask 130112  }
   0x3   :  { %v4337_v6 = vpack.c.bf16 %v151_v5, %v150_v4  ;;  %v4341_v10 = vpack.c.bf16 %v153_v9, %v152_v8  ;;  %v3827_v11 = vld [vmem:[%s5189_s3] ss:$0 sm:$0xff]  ;;  %v147_v16 = vld [vmem:[%s5190_s1 + $0x8] sm:$0xff]  ;;  %s4519_s17 = smov 80   ;;  %s4520_s18 = smov 112   ;;  %vm752_vm5 = vcmask 195712  }
   0x4   :  { %v146_v15 = vld [vmem:[%s5190_s1] sm:$0xff]  ;;  %s4521_s19 = smov 104   ;;  %s4522_s20 = smov 72   ;;  %vm924_vm6 = vcmask 261312   ;;  %vm1855_vm7 = vcmask 523264  }
   0x5   :  { %v3830_v21 = vld [vmem:[%s5191_s5] ss:$0 sm:$0xff]  ;;  %s5204_s21 = smov 48   ;;  %s5206_s22 = smov 40  }
   0x6   :  { %s4526_s24 = smov 8   ;;  %s5214_s0 = smov 16  }
   0x7   :  { %s5212_s25 = smov 24  }
   0x8   :  { %v55_v0 = vld [vmem:[%s5217_s23] sm:$0xff]  ;;  %v56_v1 = vld [vmem:[%s5217_s23 + $0x8] sm:$0xff]  ;;  %s5208_s23 = smov 56  }
   0x9   :  { %v4333_v3 = vpack.c.bf16 %v56_v1, %v55_v0 }
   0xb   :  { %4334 = vmatprep.subr.bf16.mxu0 %v4333_v3 }
   0xc   :  { %4336 = vmatpush3.bf16.msra.mxu0 %v4333_v3 }
   0xd   :  { %4338 = vmatprep.subr.bf16.mxu0 %v4337_v6 }
   0xf   :  { %4067 = vmatmul.mubr.msk.f32.vlgmr.msra.gmra.mrb[0].mxu0 %vm64_vm0, %v54_v7 }
  0x10   :  { %4340 = vmatpush3.bf16.msra.mxu0 %v4337_v6 }
  0x11   :  { %4342 = vmatprep.subr.bf16.mxu0 %v4341_v10 }
  0x14   :  { %4344 = vmatpush3.bf16.msra.mxu0 %v4341_v10 }
  0x15   :  { %4080 = vmatprep.subr.mxu0 %v4513_v20 }
  0xe2   :  { %v4068_v12 = vpop.f32.mrb[0].mxu0 }
  0xe3   :  { %v143_v13 = vadd.f32 %v4068_v12, %v3827_v11  ;;  %v137_v14 = vpop.f32.mrb[1].mxu0 }
  0xe4   :  { %v138_v17 = vadd.f32 %v3827_v11, %v137_v14 }
  0xe5   :  { %v4649_v19 = vadd.f32 %v147_v16, %v143_v13 }
  0xe6   :  { %v4647_v18 = vadd.f32 %v146_v15, %v138_v17 }
  0xe8   :  { %4077 = vmatprep.mubr.msk.f32.mxu0 %vm161_vm1, %v4647_v18 }
  0xe9   :  { %4078 = vmatmul.mubr.msk.f32.vlgmr.msra.gmra.mrb[2].mxu0 %vm161_vm1, %v4649_v19 }
  0xea   :  { %4082 = vmatprep.mubr.msk.f32.mxu0 %vm4514_vm2, %v4513_v20 }
 0x1bc   :  { %v4079_v22 = vpop.f32.mrb[2].mxu0 }
 0x1bd   :  { %v4664_v23 = vadd.f32 %v4079_v22, %v3830_v21  ;;  %v234_v24 = vpop.f32.mrb[3].mxu0 }
 0x1be   :  { %v4666_v25 = vadd.f32 %v3830_v21, %v234_v24 }
 0x1c0   :  { %333 = vrot.lane.b32.xlu1 %v4666_v25, %s5210_s28  ;;  %244 = vrot.lane.b32.xlu0 %v4666_v25, %s4516_s29 }
 0x1c4   :  { %412 = vrot.lane.b32.xlu1 %v4666_v25, %s4517_s30 }
 0x1c8   :  { %410 = vrot.lane.b32.xlu1 %v4666_v25, %s4518_s2 }
 0x1cc   :  { %584 = vrot.lane.b32.xlu1 %v4666_v25, %s4519_s17 }
 0x1d0   :  { %582 = vrot.lane.b32.xlu1 %v4666_v25, %s4520_s18 }
 0x1d4   :  { %754 = vrot.lane.b32.xlu1 %v4666_v25, %s4521_s19 }
 0x232   :  { %v334_v26 = vpop.permute.xlu1 %333  ;;  %v245_v27 = vpop.permute.xlu0 %244 }
 0x233   :  { %4081 = vmatpush3.xpose.msk.msra.mxu0 %vm246_vm3, %v245_v27  ;;  %4086 = vmatpush3.msra.mxu1 %v334_v26 }
 0x234   :  { %4090 = vmatprep.subr.mxu1 %v4513_v20  ;;  %4095 = vmatprep.subr.mxu0 %v4513_v20 }
 0x236   :  { %4083 = vmatmul.mubr.msk.f32.vlgmr.msra.gmra.mrb[4].mxu0 %vm246_vm3, %v4666_v25  ;;  %v413_v37 = vpop.permute.xlu1 %412 }
 0x237   :  { %4097 = vmatprep.mubr.msk.f32.mxu0 %vm4514_vm2, %v4513_v20 }
 0x23a   :  { %v411_v38 = vpop.permute.xlu1 %410 }
 0x23e   :  { %v585_v39 = vpop.permute.xlu1 %584 }
 0x242   :  { %v583_v40 = vpop.permute.xlu1 %582 }
 0x246   :  { %v755_v41 = vpop.permute.xlu1 %754 }
 0x309   :  { %v317_v28 = vpop.f32.mrb[4].mxu0 }
 0x30a   :  { %v321_v29 = vmul.f32 0.35355338, %v317_v28  ;;  %v4084_v30 = vpop.f32.mrb[5].mxu0 }
 0x30c   :  { %v322_v31 = vsel %vm246_vm3, %v321_v29, -inf }
 0x30d   :  { %323 = vmax.xlane.f32.xlu0 %v322_v31 }
 0x323   :  { %756 = vrot.lane.b32.xlu0 %v4666_v25, %s4522_s20 }
 0x327   :  { %1263 = vrot.lane.b32.xlu0 %v4664_v23, %s4520_s18 }
 0x32b   :  { %1434 = vrot.lane.b32.xlu0 %v4664_v23, %s4521_s19 }
 0x39a   :  { %v324_v32 = vpop.xlane.xlu0 %323 }
 0x39b   :  { %v325_v33 = vsub.f32 %v321_v29, %v324_v32 }
 0x39d   :  { %v326_v34 = vmul.f32 1.442695, %v325_v33 }
 0x39e   :  { %v757_v47 = vpop.permute.xlu0 %756 }
 0x39f   :  { %4433 = vpow2.f32 %v326_v34 }
 0x3a2   :  { %v1264_v50 = vpop.permute.xlu0 %1263 }
 0x3a6   :  { %v1435_v52 = vpop.permute.xlu0 %1434 }
 0x3a9   :  { %v4434_v35 = vpop.eup %4433 }
 0x3aa   :  { %v328_v36 = vsel %vm246_vm3, %v4434_v35, 0.0 }
 0x3ab   :  { %329 = vadd.xlane.f32.xlu1 %v328_v36 }
 0x3bc   :  { %927 = vrot.lane.b32.xlu1 %v4664_v23, %s4516_s29 }
 0x3c0   :  { %1094 = vrot.lane.b32.xlu1 %v4664_v23, %s4517_s30 }
 0x3c4   :  { %1092 = vrot.lane.b32.xlu1 %v4664_v23, %s4518_s2 }
 0x3c8   :  { %1265 = vrot.lane.b32.xlu1 %v4664_v23, %s4519_s17 }
 0x3cc   :  { %1436 = vrot.lane.b32.xlu1 %v4664_v23, %s4522_s20 }
 0x438   :  { %v330_v42 = vpop.xlane.xlu1 %329 }
 0x439   :  { %4435 = vrcp.f32 %v330_v42 }
 0x43c   :  { %v928_v45 = vpop.permute.xlu1 %927 }
 0x440   :  { %v1095_v46 = vpop.permute.xlu1 %1094 }
 0x443   :  { %v4436_v43 = vpop.eup %4435 }
 0x444   :  { %v332_v44 = vmul.f32 %v4436_v43, %v4434_v35  ;;  %v1093_v48 = vpop.permute.xlu1 %1092 }
 0x446   :  { %4088 = vmatmul.mubr.msk.f32.vlgmr.msra.gmra.mrb[0].mxu1 %vm246_vm3, %v332_v44 }
 0x447   :  { %4091 = vmatpush3.xpose.msk.msra.mxu1 %vm246_vm3, %v413_v37  ;;  %4092 = vmatprep.mubr.msk.f32.mxu1 %vm4514_vm2, %v4513_v20 }
 0x448   :  { %4100 = vmatprep.subr.mxu1 %v4513_v20  ;;  %v1266_v49 = vpop.permute.xlu1 %1265 }
 0x44a   :  { %4093 = vmatmul.mubr.msk.f32.vlgmr.msra.gmra.mrb[2].mxu1 %vm246_vm3, %v411_v38 }
 0x44b   :  { %4101 = vmatpush3.xpose.msk.msra.mxu1 %vm246_vm3, %v585_v39  ;;  %4102 = vmatprep.mubr.msk.f32.mxu1 %vm4514_vm2, %v4513_v20 }
 0x44c   :  { %4110 = vmatprep.subr.mxu1 %v4513_v20  ;;  %v1437_v51 = vpop.permute.xlu1 %1436 }
 0x44e   :  { %4103 = vmatmul.mubr.msk.f32.vlgmr.msra.gmra.mrb[4].mxu1 %vm246_vm3, %v583_v40 }
 0x44f   :  { %4111 = vmatpush3.xpose.msk.msra.mxu1 %vm246_vm3, %v757_v47  ;;  %4112 = vmatprep.mubr.msk.f32.mxu1 %vm4514_vm2, %v4513_v20 }
 0x450   :  { %4120 = vmatprep.subr.mxu1 %v4513_v20 }
 0x452   :  { %4113 = vmatmul.mubr.msk.f32.vlgmr.msra.gmra.mrb[6].mxu1 %vm246_vm3, %v755_v41 }
 0x453   :  { %4121 = vmatpush3.xpose.msk.msra.mxu1 %vm246_vm3, %v928_v45  ;;  %4122 = vmatprep.mubr.msk.f32.mxu1 %vm4514_vm2, %v4513_v20 }
 0x454   :  { %4130 = vmatprep.subr.mxu1 %v4513_v20 }
 0x456   :  { %4123 = vmatmul.mubr.msk.f32.vlgmr.msra.gmra.mrb[8].mxu1 %vm246_vm3, %v4664_v23 }
 0x457   :  { %4131 = vmatpush3.xpose.msk.msra.mxu1 %vm246_vm3, %v1095_v46  ;;  %4132 = vmatprep.mubr.msk.f32.mxu1 %vm4514_vm2, %v4513_v20 }
 0x458   :  { %4140 = vmatprep.subr.mxu1 %v4513_v20 }
 0x45a   :  { %4133 = vmatmul.mubr.msk.f32.vlgmr.msra.gmra.mrb[10].mxu1 %vm246_vm3, %v1093_v48 }
 0x45b   :  { %4141 = vmatpush3.xpose.msk.msra.mxu1 %vm246_vm3, %v1266_v49  ;;  %4142 = vmatprep.mubr.msk.f32.mxu1 %vm4514_vm2, %v4513_v20 }
 0x45c   :  { %4150 = vmatprep.subr.mxu1 %v4513_v20 }
 0x45e   :  { %4143 = vmatmul.mubr.msk.f32.vlgmr.msra.gmra.mrb[12].mxu1 %vm246_vm3, %v1264_v50 }
 0x45f   :  { %4151 = vmatpush3.xpose.msk.msra.mxu1 %vm246_vm3, %v1437_v51  ;;  %4152 = vmatprep.mubr.msk.f32.mxu1 %vm4514_vm2, %v4513_v20 }
 0x462   :  { %4153 = vmatmul.mubr.msk.f32.vlgmr.msra.gmra.mrb[14].mxu1 %vm246_vm3, %v1435_v52 }
 0x519   :  { %v405_v53 = vpop.f32.mrb[0].mxu1 }
 0x51a   :  { %409 = vst.msk [vmem:[#allocation2] sm:$0xff] %vm246_vm3, %v405_v53  ;;  %v4089_v54 = vpop.f32.mrb[1].mxu1 }
 0x51d   :  { %v484_v55 = vpop.f32.mrb[2].mxu1 }
 0x51e   :  { %v488_v56 = vmul.f32 0.35355338, %v484_v55  ;;  %v4094_v57 = vpop.f32.mrb[3].mxu1 }
 0x520   :  { %v489_v58 = vsel %vm246_vm3, %v488_v56, -inf }
 0x521   :  { %490 = vmax.xlane.f32.xlu1 %v489_v58  ;;  %v656_v59 = vpop.f32.mrb[4].mxu1 }
 0x522   :  { %v660_v60 = vmul.f32 0.35355338, %v656_v59  ;;  %v4104_v61 = vpop.f32.mrb[5].mxu1 }
 0x524   :  { %v661_v62 = vsel %vm246_vm3, %v660_v60, -inf }
 0x525   :  { %662 = vmax.xlane.f32.xlu0 %v661_v62  ;;  %v828_v63 = vpop.f32.mrb[6].mxu1 }
 0x526   :  { %v832_v0 = vmul.f32 0.35355338, %v828_v63  ;;  %v4114_v1 = vpop.f32.mrb[7].mxu1 }
 0x528   :  { %v833_v2 = vsel %vm246_vm3, %v832_v0, -inf }
 0x529   :  { %834 = vmax.xlane.f32.xlu0 %v833_v2  ;;  %v999_v3 = vpop.f32.mrb[8].mxu1 }
 0x52a   :  { %v1003_v4 = vmul.f32 0.35355338, %v999_v3  ;;  %v4124_v5 = vpop.f32.mrb[9].mxu1 }
 0x52c   :  { %v1004_v6 = vsel %vm246_vm3, %v1003_v4, -inf }
 0x52d   :  { %1005 = vmax.xlane.f32.xlu1 %v1004_v6  ;;  %v1166_v7 = vpop.f32.mrb[10].mxu1 }
 0x52e   :  { %v1170_v8 = vmul.f32 0.35355338, %v1166_v7  ;;  %v4134_v9 = vpop.f32.mrb[11].mxu1 }
 0x530   :  { %v1171_v10 = vsel %vm246_vm3, %v1170_v8, -inf }
 0x531   :  { %1172 = vmax.xlane.f32.xlu0 %v1171_v10  ;;  %v1337_v11 = vpop.f32.mrb[12].mxu1 }
 0x532   :  { %v1341_v12 = vmul.f32 0.35355338, %v1337_v11  ;;  %v4144_v13 = vpop.f32.mrb[13].mxu1 }
 0x534   :  { %v1342_v14 = vsel %vm246_vm3, %v1341_v12, -inf }
 0x535   :  { %1343 = vmax.xlane.f32.xlu1 %v1342_v14  ;;  %v1508_v15 = vpop.f32.mrb[14].mxu1 }
 0x536   :  { %v1512_v16 = vmul.f32 0.35355338, %v1508_v15  ;;  %v4154_v17 = vpop.f32.mrb[15].mxu1 }
 0x538   :  { %v1513_v21 = vsel %vm246_vm3, %v1512_v16, -inf }
 0x539   :  { %1514 = vmax.xlane.f32.xlu0 %v1513_v21 }
 0x546   :  { %672 = vrot.lane.b32.xlu1 %v4666_v25, %s5204_s21 }
 0x54a   :  { %844 = vrot.lane.b32.xlu1 %v4666_v25, %s5206_s22 }
 0x54f   :  { %500 = vrot.lane.b32.xlu0 %v4666_v25, %s5208_s23 }
 0x5ae   :  { %v491_v22 = vpop.xlane.xlu1 %490 }
 0x5af   :  { %v492_v24 = vsub.f32 %v488_v56, %v491_v22 }
 0x5b1   :  { %v493_v26 = vmul.f32 1.442695, %v492_v24 }
 0x5b2   :  { %v663_v27 = vpop.xlane.xlu0 %662 }
 0x5b3   :  { %4437 = vpow2.f32 %v493_v26  ;;  %v664_v28 = vsub.f32 %v660_v60, %v663_v27 }
 0x5b5   :  { %v665_v29 = vmul.f32 1.442695, %v664_v28 }
 0x5b6   :  { %v835_v31 = vpop.xlane.xlu0 %834 }
 0x5b7   :  { %4439 = vpow2.f32 %v665_v29  ;;  %v836_v37 = vsub.f32 %v832_v0, %v835_v31 }
 0x5b9   :  { %v837_v40 = vmul.f32 1.442695, %v836_v37 }
 0x5ba   :  { %v1006_v38 = vpop.xlane.xlu1 %1005 }
 0x5bb   :  { %v1007_v39 = vsub.f32 %v1003_v4, %v1006_v38  ;;  %4441 = vpow2.f32 %v837_v40 }
 0x5bd   :  { %v4438_v30 = vpop.eup %4437  ;;  %v1008_v43 = vmul.f32 1.442695, %v1007_v39 }
 0x5be   :  { %v495_v32 = vsel %vm246_vm3, %v4438_v30, 0.0  ;;  %v1173_v34 = vpop.xlane.xlu0 %1172 }
 0x5bf   :  { %496 = vadd.xlane.f32.xlu1 %v495_v32  ;;  %v1174_v41 = vsub.f32 %v1170_v8, %v1173_v34  ;;  %4443 = vpow2.f32 %v1008_v43  ;;  %v1607_v32 = vld [vmem:[%s5192_s6] sm:$0xff] }
 0x5c1   :  { %v4440_v33 = vpop.eup %4439  ;;  %v1175_v45 = vmul.f32 1.442695, %v1174_v41 }
 0x5c2   :  { %v667_v35 = vsel %vm246_vm3, %v4440_v33, 0.0  ;;  %v1344_v42 = vpop.xlane.xlu1 %1343 }
 0x5c3   :  { %668 = vadd.xlane.f32.xlu0 %v667_v35  ;;  %v1345_v44 = vsub.f32 %v1341_v12, %v1344_v42  ;;  %4445 = vpow2.f32 %v1175_v45 }
 0x5c5   :  { %v1346_v47 = vmul.f32 1.442695, %v1345_v44  ;;  %v4442_v49 = vpop.eup %4441 }
 0x5c6   :  { %v1515_v36 = vpop.xlane.xlu0 %1514  ;;  %v839_v51 = vsel %vm246_vm3, %v4442_v49, 0.0  ;;  %v673_v59 = vpop.permute.xlu1 %672 }
 0x5c7   :  { %v1516_v46 = vsub.f32 %v1512_v16, %v1515_v36  ;;  %4447 = vpow2.f32 %v1346_v47  ;;  %v1609_v36 = vld [vmem:[%s5192_s6 + $0x10] sm:$0xff] }
 0x5c9   :  { %v1517_v48 = vmul.f32 1.442695, %v1516_v46  ;;  %v4444_v50 = vpop.eup %4443 }
 0x5ca   :  { %v501_v25 = vpop.permute.xlu0 %500  ;;  %v1010_v54 = vsel %vm246_vm3, %v4444_v50, 0.0  ;;  %v845_v60 = vpop.permute.xlu1 %844 }
 0x5cb   :  { %4096 = vmatpush3.msra.mxu0 %v501_v25  ;;  %4449 = vpow2.f32 %v1517_v48  ;;  %v1610_v25 = vld [vmem:[%s5192_s6 + $0x18] sm:$0xff] }
 0x5cc   :  { %4105 = vmatprep.subr.mxu0 %v4513_v20  ;;  %v4349_v38 = vpack.c.bf16 %v1610_v25, %v1609_v36 }
 0x5cd   :  { %v4446_v52 = vpop.eup %4445 }
 0x5ce   :  { %v1177_v55 = vsel %vm246_vm3, %v4446_v52, 0.0 }
 0x5d0   :  { %1182 = vrot.lane.b32.xlu1 %v4664_v23, %s5208_s23 }
 0x5d1   :  { %v4448_v53 = vpop.eup %4447 }
 0x5d2   :  { %v1348_v57 = vsel %vm246_vm3, %v4448_v53, 0.0 }
 0x5d5   :  { %v4767_v56 = vpop.eup %4449 }
 0x5d6   :  { %v1519_v58 = vsel %vm246_vm3, %v4767_v56, 0.0 }
 0x5d9   :  { %1015 = vrot.lane.b32.xlu0 %v4664_v23, %s5210_s28 }
 0x5f4   :  { %840 = vadd.xlane.f32.xlu1 %v839_v51 }
 0x5f8   :  { %1011 = vadd.xlane.f32.xlu0 %v1010_v54  ;;  %1178 = vadd.xlane.f32.xlu1 %v1177_v55 }
 0x5fc   :  { %1349 = vadd.xlane.f32.xlu0 %v1348_v57  ;;  %1520 = vadd.xlane.f32.xlu1 %v1519_v58 }
 0x60d   :  { %1524 = vrot.lane.b32.xlu1 %v4664_v23, %s5206_s22 }
 0x612   :  { %1353 = vrot.lane.b32.xlu0 %v4664_v23, %s5204_s21 }
 0x64c   :  { %v497_v61 = vpop.xlane.xlu1 %496 }
 0x64d   :  { %4451 = vrcp.f32 %v497_v61 }
 0x650   :  { %v669_v62 = vpop.xlane.xlu0 %668  ;;  %v1183_v23 = vpop.permute.xlu1 %1182 }
 0x651   :  { %4453 = vrcp.f32 %v669_v62 }
 0x654   :  { %v1016_v3 = vpop.permute.xlu0 %1015 }
 0x657   :  { %v4452_v63 = vpop.eup %4451 }
 0x658   :  { %v499_v0 = vmul.f32 %v4452_v63, %v4438_v30 }
 0x65a   :  { %4098 = vmatmul.mubr.msk.f32.vlgmr.msra.gmra.mrb[6].mxu0 %vm246_vm3, %v499_v0 }
 0x65b   :  { %v4454_v1 = vpop.eup %4453  ;;  %4106 = vmatpush3.msra.mxu0 %v673_v59  ;;  %4107 = vmatprep.mubr.msk.f32.mxu0 %vm4514_vm2, %v4513_v20 }
 0x65c   :  { %v671_v2 = vmul.f32 %v4454_v1, %v4440_v33  ;;  %4115 = vmatprep.subr.mxu0 %v4513_v20  ;;  %v1608_v33 = vld [vmem:[%s5192_s6 + $0x8] sm:$0xff] }
 0x65d   :  { %v4345_v34 = vpack.c.bf16 %v1608_v33, %v1607_v32  ;;  %v3860_v32 = vld [vmem:[%s5196_s12] ss:$0 sm:$0xff] }
 0x65e   :  { %4108 = vmatmul.mubr.msk.f32.vlgmr.msra.gmra.mrb[8].mxu0 %vm246_vm3, %v671_v2 }
 0x65f   :  { %4116 = vmatpush3.msra.mxu0 %v845_v60  ;;  %4117 = vmatprep.mubr.msk.f32.mxu0 %vm4514_vm2, %v4513_v20 }
 0x660   :  { %4125 = vmatprep.subr.mxu0 %v4513_v20  ;;  %4346 = vmatprep.subr.bf16.mxu1 %v4345_v34 }
 0x661   :  { %4348 = vmatpush3.bf16.msra.mxu1 %v4345_v34  ;;  %v3861_v34 = vld [vmem:[%s5197_s13] ss:$0 sm:$0xff] }
 0x662   :  { %4350 = vmatprep.subr.bf16.mxu1 %v4349_v38 }
 0x665   :  { %4352 = vmatpush3.bf16.msra.mxu1 %v4349_v38 }
 0x681   :  { %v841_v4 = vpop.xlane.xlu1 %840 }
 0x682   :  { %4455 = vrcp.f32 %v841_v4 }
 0x685   :  { %v1012_v5 = vpop.xlane.xlu0 %1011  ;;  %v1179_v6 = vpop.xlane.xlu1 %1178 }
 0x686   :  { %4457 = vrcp.f32 %v1012_v5 }
 0x687   :  { %4459 = vrcp.f32 %v1179_v6  ;;  %v1747_v6 = vld [vmem:[%s5194_s8 + $0x8] sm:$0xff] }
 0x689   :  { %v1350_v7 = vpop.xlane.xlu0 %1349  ;;  %v1521_v10 = vpop.xlane.xlu1 %1520 }
 0x68a   :  { %4461 = vrcp.f32 %v1350_v7 }
 0x68b   :  { %4463 = vrcp.f32 %v1521_v10 }
 0x68c   :  { %v4456_v8 = vpop.eup %4455 }
 0x68d   :  { %v843_v9 = vmul.f32 %v4456_v8, %v4442_v49  ;;  %v1354_v16 = vpop.permute.xlu0 %1353  ;;  %v1525_v22 = vpop.permute.xlu1 %1524  ;;  %v1748_v8 = vld [vmem:[%s5194_s8 + $0x10] sm:$0xff] }
 0x68f   :  { %4118 = vmatmul.mubr.msk.f32.vlgmr.msra.gmra.mrb[10].mxu0 %vm246_vm3, %v843_v9  ;;  %v1749_v9 = vld [vmem:[%s5194_s8 + $0x18] sm:$0xff] }
 0x690   :  { %4126 = vmatpush3.msra.mxu0 %v1016_v3  ;;  %4127 = vmatprep.mubr.msk.f32.mxu0 %vm4514_vm2, %v4513_v20  ;;  %v4458_v11 = vpop.eup %4457  ;;  %v4357_v10 = vpack.c.bf16 %v1749_v9, %v1748_v8 }
 0x691   :  { %4135 = vmatprep.subr.mxu0 %v4513_v20  ;;  %v1014_v12 = vmul.f32 %v4458_v11, %v4444_v50  ;;  %v4460_v13 = vpop.eup %4459  ;;  %v1840_v11 = vld [vmem:[%s5195_s10] sm:$0xff] }
 0x692   :  { %v1181_v14 = vmul.f32 %v4460_v13, %v4446_v52  ;;  %v1842_v13 = vld [vmem:[%s5195_s10 + $0x10] sm:$0xff] }
 0x693   :  { %4128 = vmatmul.mubr.msk.f32.vlgmr.msra.gmra.mrb[12].mxu0 %vm246_vm3, %v1014_v12  ;;  %v1841_v12 = vld [vmem:[%s5195_s10 + $0x8] sm:$0xff] }
 0x694   :  { %4136 = vmatpush3.msra.mxu0 %v1183_v23  ;;  %4137 = vmatprep.mubr.msk.f32.mxu0 %vm4514_vm2, %v4513_v20  ;;  %v4462_v15 = vpop.eup %4461 }
 0x695   :  { %4145 = vmatprep.subr.mxu0 %v4513_v20  ;;  %v1352_v17 = vmul.f32 %v4462_v15, %v4448_v53  ;;  %v4464_v21 = vpop.eup %4463  ;;  %v3857_v53 = vld [vmem:[%s5193_s7] ss:$0 sm:$0xff]  ;;  %v1843_v15 = vld [vmem:[%s5195_s10 + $0x18] sm:$0xff] }
 0x696   :  { %v1523_v24 = vmul.f32 %v4464_v21, %v4767_v56  ;;  %v1845_v21 = vld [vmem:[%s5195_s10 + $0x28] sm:$0xff] }
 0x697   :  { %4138 = vmatmul.mubr.msk.f32.vlgmr.msra.gmra.mrb[14].mxu0 %vm246_vm3, %v1181_v14  ;;  %v4361_v14 = vpack.c.bf16 %v1841_v12, %v1840_v11 }
 0x698   :  { %4146 = vmatpush3.msra.mxu0 %v1354_v16  ;;  %4147 = vmatprep.mubr.msk.f32.mxu0 %vm4514_vm2, %v4513_v20  ;;  %v4365_v16 = vpack.c.bf16 %v1843_v15, %v1842_v13  ;;  %v3868_v15 = vld [vmem:[%s5200_s14] ss:$0 sm:$0xff] }
 0x699   :  { %4155 = vmatprep.subr.mxu0 %v4513_v20  ;;  %4362 = vmatprep.subr.bf16.mxu1 %v4361_v14 }
 0x69b   :  { %4148 = vmatmul.mubr.msk.f32.vlgmr.msra.gmra.mrb[16].mxu0 %vm246_vm3, %v1352_v17  ;;  %v1844_v17 = vld [vmem:[%s5195_s10 + $0x20] sm:$0xff] }
 0x69c   :  { %4156 = vmatpush3.msra.mxu0 %v1525_v22  ;;  %4157 = vmatprep.mubr.msk.f32.mxu0 %vm4514_vm2, %v4513_v20  ;;  %v4369_v22 = vpack.c.bf16 %v1845_v21, %v1844_v17 }
 0x69f   :  { %4158 = vmatmul.mubr.msk.f32.vlgmr.msra.gmra.mrb[18].mxu0 %vm246_vm3, %v1523_v24 }
 0x72d   :  { %v572_v26 = vpop.f32.mrb[6].mxu0 }
 0x72e   :  { %577 = vrot.lane.b32.xlu0 %v572_v26, %s4526_s24  ;;  %v4099_v27 = vpop.f32.mrb[7].mxu0 }
 0x731   :  { %v744_v28 = vpop.f32.mrb[8].mxu0 }
 0x732   :  { %749 = vrot.lane.b32.xlu1 %v744_v28, %s5214_s0  ;;  %v4109_v29 = vpop.f32.mrb[9].mxu0 }
 0x762   :  { %v916_v30 = vpop.f32.mrb[10].mxu0 }
 0x763   :  { %921 = vrot.lane.b32.xlu1 %v916_v30, %s5212_s25  ;;  %v4119_v31 = vpop.f32.mrb[11].mxu0 }
 0x766   :  { %v1087_v35 = vpop.f32.mrb[12].mxu0 }
 0x767   :  { %1091 = vst.msk [vmem:[#allocation2 + $0x8] sm:$0xff] %vm246_vm3, %v1087_v35  ;;  %v4129_v37 = vpop.f32.mrb[13].mxu0 }
 0x76a   :  { %v1254_v39 = vpop.f32.mrb[14].mxu0 }
 0x76b   :  { %1259 = vrot.lane.b32.xlu0 %v1254_v39, %s4526_s24  ;;  %v4139_v40 = vpop.f32.mrb[15].mxu0 }
 0x76c   :  { %v1846_v40 = vld [vmem:[%s5195_s10 + $0x30] sm:$0xff] }
 0x76e   :  { %v1425_v41 = vpop.f32.mrb[16].mxu0 }
 0x76f   :  { %1430 = vrot.lane.b32.xlu0 %v1425_v41, %s5214_s0  ;;  %v4149_v42 = vpop.f32.mrb[17].mxu0  ;;  %v1847_v41 = vld [vmem:[%s5195_s10 + $0x38] sm:$0xff] }
 0x770   :  { %v4373_v42 = vpack.c.bf16 %v1847_v41, %v1846_v40 }
 0x772   :  { %v1596_v43 = vpop.f32.mrb[18].mxu0 }
 0x773   :  { %1601 = vrot.lane.b32.xlu1 %v1596_v43, %s5212_s25  ;;  %v4159_v44 = vpop.f32.mrb[19].mxu0  ;;  %v3862_v43 = vld [vmem:[%s5198_s9] ss:$0 sm:$0xff] }
 0x7a0   :  { %v578_v45 = vpop.permute.xlu0 %577 }
 0x7a1   :  { %581 = vst.msk [vmem:[#allocation2] sm:$0xff] %vm580_vm4, %v578_v45 }
 0x7a4   :  { %v750_v46 = vpop.permute.xlu1 %749 }
 0x7a5   :  { %753 = vst.msk [vmem:[#allocation2] sm:$0xff] %vm752_vm5, %v750_v46 }
 0x7d5   :  { %v922_v47 = vpop.permute.xlu1 %921 }
 0x7d6   :  { %925 = vst.msk [vmem:[#allocation2] sm:$0xff] %vm924_vm6, %v922_v47 }
 0x7dd   :  { %v1605_v48 = vld [vmem:[#allocation2] sm:$0xff]  ;;  %v1260_v49 = vpop.permute.xlu0 %1259 }
 0x7de   :  { %4168 = vmatprep.mubr.msk.f32.mxu1 %vm161_vm1, %v1605_v48  ;;  %1262 = vst.msk [vmem:[#allocation2 + $0x8] sm:$0xff] %vm580_vm4, %v1260_v49 }
 0x7e1   :  { %v1431_v50 = vpop.permute.xlu0 %1430 }
 0x7e2   :  { %1433 = vst.msk [vmem:[#allocation2 + $0x8] sm:$0xff] %vm752_vm5, %v1431_v50  ;;  %v3865_v50 = vld [vmem:[%s5199_s11] ss:$0 sm:$0xff] }
 0x7e5   :  { %v1602_v51 = vpop.permute.xlu1 %1601 }
 0x7e6   :  { %1604 = vst.msk [vmem:[#allocation2 + $0x8] sm:$0xff] %vm924_vm6, %v1602_v51 }
 0x7ed   :  { %v1606_v52 = vld [vmem:[#allocation2 + $0x8] sm:$0xff] }
 0x7ee   :  { %4169 = vmatmul.mubr.msk.f32.vlgmr.msra.gmra.mrb[16].mxu1 %vm161_vm1, %v1606_v52 }
 0x7ef   :  { %4364 = vmatpush3.bf16.msra.mxu1 %v4361_v14 }
 0x7f0   :  { %4366 = vmatprep.subr.bf16.mxu1 %v4365_v16 }
 0x7f3   :  { %4368 = vmatpush3.bf16.msra.mxu1 %v4365_v16 }
 0x7f4   :  { %4370 = vmatprep.subr.bf16.mxu1 %v4369_v22 }
 0x7f7   :  { %4372 = vmatpush3.bf16.msra.mxu1 %v4369_v22  ;;  %v3869_v22 = vld [vmem:[%s5201_s15] ss:$0 sm:$0xff] }
 0x7f8   :  { %4374 = vmatprep.subr.bf16.mxu1 %v4373_v42 }
 0x7fb   :  { %4376 = vmatpush3.bf16.msra.mxu1 %v4373_v42 }
 0x7fc   :  { %4222 = vmatprep.subr.mxu1 %v4513_v20 }
 0x8c1   :  { %v4170_v54 = vpop.f32.mrb[16].mxu1 }
 0x8c2   :  { %v1696_v55 = vadd.f32 %v4170_v54, %v3857_v53  ;;  %v1690_v56 = vpop.f32.mrb[17].mxu1 }
 0x8c3   :  { %v1691_v57 = vadd.f32 %v3857_v53, %v1690_v56 }
 0x8c4   :  { %v1700_v58 = vadd.f32 %v1696_v55, %v4649_v19 }
 0x8c5   :  { %v1699_v59 = vadd.f32 %v1691_v57, %v4647_v18  ;;  %v1746_v18 = vld [vmem:[%s5194_s8] sm:$0xff] }
 0x8c6   :  { %v1706_v60 = vsel %vm161_vm1, %v1700_v58, 0.0  ;;  %v4353_v7 = vpack.c.bf16 %v1747_v6, %v1746_v18  ;;  %v3872_v18 = vld [vmem:[%s5188_s4 + $0x30] sm:$0xff]  ;;  %v3873_v6 = vld [vmem:[%s5188_s4 + $0x38] sm:$0xff] }
 0x8c7   :  { %1707 = vadd.xlane.f32.xlu1 %v1706_v60  ;;  %v1703_v61 = vsel %vm161_vm1, %v1699_v59, 0.0 }
 0x8c8   :  { %1704 = vadd.xlane.f32.xlu0 %v1703_v61  ;;  %4354 = vmatprep.subr.bf16.mxu0 %v4353_v7 }
 0x8c9   :  { %4356 = vmatpush3.bf16.msra.mxu0 %v4353_v7  ;;  %v4381_v7 = vpack.c.bf16 %v3873_v6, %v3872_v18 }
 0x8ca   :  { %4358 = vmatprep.subr.bf16.mxu0 %v4357_v10 }
 0x8cd   :  { %4360 = vmatpush3.bf16.msra.mxu0 %v4357_v10 }
 0x954   :  { %v1708_v62 = vpop.xlane.xlu1 %1707 }
 0x955   :  { %v1711_v63 = vmul.f32 0.03125, %v1708_v62  ;;  %v1705_v0 = vpop.xlane.xlu0 %1704 }
 0x956   :  { %v1710_v1 = vmul.f32 0.03125, %v1705_v0 }
 0x957   :  { %v1713_v2 = vsub.f32 %v1700_v58, %v1711_v63 }
 0x958   :  { %v1712_v23 = vsub.f32 %v1699_v59, %v1710_v1 }
 0x959   :  { %v1715_v5 = vmul.f32 %v1713_v2, %v1713_v2 }
 0x95a   :  { %v1714_v3 = vmul.f32 %v1712_v23, %v1712_v23 }
 0x95b   :  { %v1719_v19 = vsel %vm161_vm1, %v1715_v5, 0.0  ;;  %v3871_v5 = vld [vmem:[%s5188_s4 + $0x28] sm:$0xff] }
 0x95c   :  { %v1716_v4 = vsel %vm161_vm1, %v1714_v3, 0.0 }
 0x95d   :  { %1717 = vadd.xlane.f32.xlu0 %v1716_v4  ;;  %v3870_v4 = vld [vmem:[%s5188_s4 + $0x20] sm:$0xff] }
 0x961   :  { %1720 = vadd.xlane.f32.xlu0 %v1719_v19  ;;  %v4377_v19 = vpack.c.bf16 %v3871_v5, %v3870_v4 }
 0x963   :  { %4378 = vmatprep.subr.bf16.mxu0 %v4377_v19 }
 0x9ea   :  { %v1718_v24 = vpop.xlane.xlu0 %1717 }
 0x9eb   :  { %v1722_v26 = vmul.f32 0.03125, %v1718_v24 }
 0x9ed   :  { %v1724_v27 = vadd.f32 1e-05, %v1722_v26 }
 0x9ee   :  { %v1721_v28 = vpop.xlane.xlu0 %1720 }
 0x9ef   :  { %4465 = vrsqrt.f32 %v1724_v27  ;;  %v1723_v29 = vmul.f32 0.03125, %v1721_v28 }
 0x9f1   :  { %v1725_v30 = vadd.f32 1e-05, %v1723_v29  ;;  %v3875_v29 = vld [vmem:[%s5191_s5 + $0x1] ss:$0 sm:$0xff]  ;;  %s5218_s5 = smov 64  }
 0x9f3   :  { %4467 = vrsqrt.f32 %v1725_v30 }
 0x9f9   :  { %v4466_v31 = vpop.eup %4465 }
 0x9fa   :  { %v1728_v33 = vmul.f32 %v4466_v31, %v1712_v23 }
 0x9fc   :  { %v1736_v35 = vmul.f32 %v3860_v32, %v1728_v33 }
 0x9fd   :  { %v4468_v36 = vpop.eup %4467 }
 0x9fe   :  { %v1729_v25 = vmul.f32 %v4468_v36, %v1713_v2  ;;  %v1744_v37 = vadd.f32 %v3861_v34, %v1736_v35 }
 0xa00   :  { %v1737_v38 = vmul.f32 %v3860_v32, %v1729_v25  ;;  %4179 = vmatprep.mubr.msk.f32.mxu0 %vm161_vm1, %v1744_v37 }
 0xa02   :  { %v1745_v39 = vadd.f32 %v3861_v34, %v1737_v38 }
 0xa04   :  { %4180 = vmatmul.mubr.msk.f32.vlgmr.msra.gmra.mrb[20].mxu0 %vm161_vm1, %v1745_v39 }
 0xa05   :  { %4380 = vmatpush3.bf16.msra.mxu0 %v4377_v19 }
 0xa06   :  { %4382 = vmatprep.subr.bf16.mxu0 %v4381_v7 }
 0xa09   :  { %4384 = vmatpush3.bf16.msra.mxu0 %v4381_v7 }
 0xa0a   :  { %4212 = vmatprep.subr.mxu0 %v4513_v20 }
 0xad7   :  { %v4181_v44 = vpop.f32.mrb[20].mxu0 }
 0xad8   :  { %v1835_v45 = vadd.f32 %v4181_v44, %v3862_v43  ;;  %v1829_v46 = vpop.f32.mrb[21].mxu0 }
 0xad9   :  { %v1830_v47 = vadd.f32 %v3862_v43, %v1829_v46 }
 0xada   :  { %v1839_v49 = vmax.f32 %v1835_v45, 0.0 }
 0xadb   :  { %v1838_v48 = vmax.f32 %v1830_v47, 0.0 }
 0xadd   :  { %4198 = vmatprep.mubr.msk.f32.mxu1 %vm1855_vm7, %v1838_v48 }
 0xade   :  { %4199 = vmatmul.mubr.msk.f32.vlgmr.msra.gmra.mrb[18].mxu1 %vm1855_vm7, %v1839_v49 }
 0xadf   :  { %4224 = vmatprep.mubr.msk.f32.mxu1 %vm4514_vm2, %v4513_v20 }
 0xbb1   :  { %v4200_v51 = vpop.f32.mrb[18].mxu1 }
 0xbb2   :  { %v1934_v52 = vadd.f32 %v4200_v51, %v3865_v50  ;;  %v1928_v53 = vpop.f32.mrb[19].mxu1 }
 0xbb3   :  { %v1929_v54 = vadd.f32 %v3865_v50, %v1928_v53 }
 0xbb4   :  { %v1938_v55 = vadd.f32 %v1934_v52, %v1745_v39 }
 0xbb5   :  { %v1937_v56 = vadd.f32 %v1929_v54, %v1744_v37 }
 0xbb6   :  { %v1944_v57 = vsel %vm161_vm1, %v1938_v55, 0.0 }
 0xbb7   :  { %1945 = vadd.xlane.f32.xlu0 %v1944_v57  ;;  %v1941_v58 = vsel %vm161_vm1, %v1937_v56, 0.0 }
 0xbb8   :  { %1942 = vadd.xlane.f32.xlu1 %v1941_v58 }
 0xc44   :  { %v1946_v59 = vpop.xlane.xlu0 %1945 }
 0xc45   :  { %v1948_v60 = vmul.f32 0.03125, %v1946_v59  ;;  %v1943_v61 = vpop.xlane.xlu1 %1942 }
 0xc46   :  { %v1947_v62 = vmul.f32 0.03125, %v1943_v61 }
 0xc47   :  { %v1950_v63 = vsub.f32 %v1938_v55, %v1948_v60 }
 0xc48   :  { %v1949_v0 = vsub.f32 %v1937_v56, %v1947_v62 }
 0xc49   :  { %v1952_v1 = vmul.f32 %v1950_v63, %v1950_v63 }
 0xc4a   :  { %v1951_v2 = vmul.f32 %v1949_v0, %v1949_v0 }
 0xc4b   :  { %v1956_v23 = vsel %vm161_vm1, %v1952_v1, 0.0 }
 0xc4c   :  { %1957 = vadd.xlane.f32.xlu0 %v1956_v23  ;;  %v1953_v3 = vsel %vm161_vm1, %v1951_v2, 0.0 }
 0xc4d   :  { %1954 = vadd.xlane.f32.xlu1 %v1953_v3 }
 0xcd9   :  { %v1958_v8 = vpop.xlane.xlu0 %1957 }
 0xcda   :  { %v1960_v9 = vmul.f32 0.03125, %v1958_v8  ;;  %v1955_v10 = vpop.xlane.xlu1 %1954 }
 0xcdb   :  { %v1959_v11 = vmul.f32 0.03125, %v1955_v10 }
 0xcdc   :  { %v1962_v12 = vadd.f32 1e-05, %v1960_v9 }
 0xcdd   :  { %v1961_v13 = vadd.f32 1e-05, %v1959_v11 }
 0xcde   :  { %4469 = vrsqrt.f32 %v1962_v12 }
 0xcdf   :  { %4471 = vrsqrt.f32 %v1961_v13 }
 0xce8   :  { %v4470_v14 = vpop.eup %4469 }
 0xce9   :  { %v4472_v16 = vpop.eup %4471  ;;  %v1966_v17 = vmul.f32 %v4470_v14, %v1950_v63 }
 0xcea   :  { %v1965_v21 = vmul.f32 %v4472_v16, %v1949_v0 }
 0xceb   :  { %v1974_v24 = vmul.f32 %v3868_v15, %v1966_v17 }
 0xcec   :  { %v1973_v26 = vmul.f32 %v3868_v15, %v1965_v21 }
 0xced   :  { %v4917_v28 = vadd.f32 %v3869_v22, %v1974_v24 }
 0xcee   :  { %v4915_v27 = vadd.f32 %v3869_v22, %v1973_v26 }
 0xcf0   :  { %4209 = vmatprep.mubr.msk.f32.mxu0 %vm161_vm1, %v4915_v27 }
 0xcf1   :  { %4210 = vmatmul.mubr.msk.f32.vlgmr.msra.gmra.mrb[22].mxu0 %vm161_vm1, %v4917_v28 }
 0xcf2   :  { %4214 = vmatprep.mubr.msk.f32.mxu0 %vm4514_vm2, %v4513_v20 }
 0xdc4   :  { %v4211_v30 = vpop.f32.mrb[22].mxu0 }
 0xdc5   :  { %v2068_v31 = vpop.f32.mrb[23].mxu0  ;;  %v4942_v33 = vadd.f32 %v4211_v30, %v3875_v29 }
 0xdc6   :  { %v4928_v32 = vadd.f32 %v3875_v29, %v2068_v31 }
 0xdc8   :  { %2245 = vrot.lane.b32.xlu0 %v4928_v32, %s4517_s30  ;;  %2078 = vrot.lane.b32.xlu1 %v4928_v32, %s4516_s29 }
 0xdcc   :  { %2414 = vrot.lane.b32.xlu0 %v4928_v32, %s4520_s18  ;;  %2243 = vrot.lane.b32.xlu1 %v4928_v32, %s4518_s2 }
 0xdd0   :  { %2585 = vrot.lane.b32.xlu0 %v4928_v32, %s4521_s19  ;;  %2416 = vrot.lane.b32.xlu1 %v4928_v32, %s4519_s17 }
 0xdd4   :  { %2924 = vrot.lane.b32.xlu0 %v4942_v33, %s4517_s30  ;;  %2587 = vrot.lane.b32.xlu1 %v4928_v32, %s4522_s20  ;;  %s5219_s30 = smov 56  }
 0xdd8   :  { %3095 = vrot.lane.b32.xlu0 %v4942_v33, %s4519_s17  ;;  %2757 = vrot.lane.b32.xlu1 %v4942_v33, %s4516_s29  ;;  %s5220_s29 = smov 40   ;;  %s5222_s17 = smov 16  }
 0xddc   :  { %3266 = vrot.lane.b32.xlu0 %v4942_v33, %s4522_s20  ;;  %2922 = vrot.lane.b32.xlu1 %v4942_v33, %s4518_s2  ;;  %s5221_s2 = smov 48  }
 0xde0   :  { %2166 = vrot.lane.b32.xlu0 %v4928_v32, %s5218_s5  ;;  %3093 = vrot.lane.b32.xlu1 %v4942_v33, %s4520_s18  ;;  %s5223_s18 = smov 24  }
 0xde4   :  { %3264 = vrot.lane.b32.xlu1 %v4942_v33, %s4521_s19 }
 0xde8   :  { %2333 = vrot.lane.b32.xlu1 %v4928_v32, %s5219_s30 }
 0xe3a   :  { %v2246_v34 = vpop.permute.xlu0 %2245  ;;  %v2079_v35 = vpop.permute.xlu1 %2078 }
 0xe3b   :  { %4213 = vmatpush3.xpose.msk.msra.mxu0 %vm246_vm3, %v2079_v35  ;;  %4223 = vmatpush3.xpose.msk.msra.mxu1 %vm246_vm3, %v2246_v34 }
 0xe3c   :  { %4232 = vmatprep.subr.mxu1 %v4513_v20  ;;  %4217 = vmatprep.subr.mxu0 %v4513_v20 }
 0xe3e   :  { %v2415_v36 = vpop.permute.xlu0 %2414  ;;  %4215 = vmatmul.mubr.msk.f32.vlgmr.msra.gmra.mrb[24].mxu0 %vm246_vm3, %v4928_v32  ;;  %v2244_v25 = vpop.permute.xlu1 %2243 }
 0xe3f   :  { %4225 = vmatmul.mubr.msk.f32.vlgmr.msra.gmra.mrb[20].mxu1 %vm246_vm3, %v2244_v25  ;;  %4219 = vmatprep.mubr.msk.f32.mxu0 %vm4514_vm2, %v4513_v20 }
 0xe40   :  { %4234 = vmatprep.mubr.msk.f32.mxu1 %vm4514_vm2, %v4513_v20 }
 0xe42   :  { %v2586_v37 = vpop.permute.xlu0 %2585  ;;  %v2417_v38 = vpop.permute.xlu1 %2416 }
 0xe43   :  { %4233 = vmatpush3.xpose.msk.msra.mxu1 %vm246_vm3, %v2417_v38 }
 0xe44   :  { %4242 = vmatprep.subr.mxu1 %v4513_v20 }
 0xe46   :  { %v2925_v39 = vpop.permute.xlu0 %2924  ;;  %4235 = vmatmul.mubr.msk.f32.vlgmr.msra.gmra.mrb[22].mxu1 %vm246_vm3, %v2415_v36  ;;  %v2588_v40 = vpop.permute.xlu1 %2587 }
 0xe47   :  { %4243 = vmatpush3.xpose.msk.msra.mxu1 %vm246_vm3, %v2588_v40  ;;  %4244 = vmatprep.mubr.msk.f32.mxu1 %vm4514_vm2, %v4513_v20 }
 0xe48   :  { %4252 = vmatprep.subr.mxu1 %v4513_v20 }
 0xe4a   :  { %v3096_v41 = vpop.permute.xlu0 %3095  ;;  %4245 = vmatmul.mubr.msk.f32.vlgmr.msra.gmra.mrb[24].mxu1 %vm246_vm3, %v2586_v37  ;;  %v2758_v42 = vpop.permute.xlu1 %2757 }
 0xe4b   :  { %4253 = vmatpush3.xpose.msk.msra.mxu1 %vm246_vm3, %v2758_v42  ;;  %4254 = vmatprep.mubr.msk.f32.mxu1 %vm4514_vm2, %v4513_v20 }
 0xe4c   :  { %4262 = vmatprep.subr.mxu1 %v4513_v20 }
 0xe4e   :  { %v3267_v43 = vpop.permute.xlu0 %3266  ;;  %4255 = vmatmul.mubr.msk.f32.vlgmr.msra.gmra.mrb[26].mxu1 %vm246_vm3, %v4942_v33  ;;  %v2923_v44 = vpop.permute.xlu1 %2922 }
 0xe4f   :  { %4263 = vmatpush3.xpose.msk.msra.mxu1 %vm246_vm3, %v2925_v39  ;;  %4264 = vmatprep.mubr.msk.f32.mxu1 %vm4514_vm2, %v4513_v20 }
 0xe50   :  { %4272 = vmatprep.subr.mxu1 %v4513_v20 }
 0xe52   :  { %v2167_v45 = vpop.permute.xlu0 %2166  ;;  %4265 = vmatmul.mubr.msk.f32.vlgmr.msra.gmra.mrb[28].mxu1 %vm246_vm3, %v2923_v44  ;;  %v3094_v46 = vpop.permute.xlu1 %3093 }
 0xe53   :  { %4218 = vmatpush3.msra.mxu0 %v2167_v45  ;;  %4273 = vmatpush3.xpose.msk.msra.mxu1 %vm246_vm3, %v3096_v41 }
 0xe54   :  { %4274 = vmatprep.mubr.msk.f32.mxu1 %vm4514_vm2, %v4513_v20  ;;  %4282 = vmatprep.subr.mxu1 %v4513_v20 }
 0xe55   :  { %4227 = vmatprep.subr.mxu0 %v4513_v20 }
 0xe56   :  { %4275 = vmatmul.mubr.msk.f32.vlgmr.msra.gmra.mrb[30].mxu1 %vm246_vm3, %v3094_v46  ;;  %v3265_v47 = vpop.permute.xlu1 %3264 }
 0xe57   :  { %4283 = vmatpush3.xpose.msk.msra.mxu1 %vm246_vm3, %v3267_v43  ;;  %4284 = vmatprep.mubr.msk.f32.mxu1 %vm4514_vm2, %v4513_v20 }
 0xe5a   :  { %4285 = vmatmul.mubr.msk.f32.vlgmr.msra.gmra.mrb[32].mxu1 %vm246_vm3, %v3265_v47  ;;  %v5016_v13 = vpop.permute.xlu1 %2333 }
 0xf11   :  { %v2150_v48 = vpop.f32.mrb[24].mxu0 }
 0xf12   :  { %v2154_v49 = vmul.f32 0.35355338, %v2150_v48  ;;  %v4216_v50 = vpop.f32.mrb[25].mxu0  ;;  %v2317_v51 = vpop.f32.mrb[20].mxu1 }
 0xf13   :  { %v2321_v52 = vmul.f32 0.35355338, %v2317_v51  ;;  %v4226_v53 = vpop.f32.mrb[21].mxu1 }
 0xf14   :  { %v2155_v54 = vsel %vm246_vm3, %v2154_v49, -inf }
 0xf15   :  { %2156 = vmax.xlane.f32.xlu0 %v2155_v54  ;;  %v2322_v55 = vsel %vm246_vm3, %v2321_v52, -inf }
 0xf16   :  { %2323 = vmax.xlane.f32.xlu1 %v2322_v55 }
 0xf19   :  { %v2488_v56 = vpop.f32.mrb[22].mxu1 }
 0xf1a   :  { %v2492_v57 = vmul.f32 0.35355338, %v2488_v56  ;;  %v4236_v58 = vpop.f32.mrb[23].mxu1 }
 0xf1c   :  { %v2493_v59 = vsel %vm246_vm3, %v2492_v57, -inf }
 0xf1d   :  { %2494 = vmax.xlane.f32.xlu0 %v2493_v59  ;;  %v2659_v60 = vpop.f32.mrb[24].mxu1 }
 0xf1e   :  { %v2663_v61 = vmul.f32 0.35355338, %v2659_v60  ;;  %v4246_v62 = vpop.f32.mrb[25].mxu1 }
 0xf20   :  { %v2664_v63 = vsel %vm246_vm3, %v2663_v61, -inf }
 0xf21   :  { %2665 = vmax.xlane.f32.xlu0 %v2664_v63  ;;  %v2829_v0 = vpop.f32.mrb[26].mxu1 }
 0xf22   :  { %v2833_v1 = vmul.f32 0.35355338, %v2829_v0  ;;  %v4256_v2 = vpop.f32.mrb[27].mxu1 }
 0xf24   :  { %v2834_v23 = vsel %vm246_vm3, %v2833_v1, -inf }
 0xf25   :  { %2835 = vmax.xlane.f32.xlu1 %v2834_v23  ;;  %v2996_v3 = vpop.f32.mrb[28].mxu1 }
 0xf26   :  { %v3000_v4 = vmul.f32 0.35355338, %v2996_v3  ;;  %v4266_v5 = vpop.f32.mrb[29].mxu1 }
 0xf28   :  { %v3001_v19 = vsel %vm246_vm3, %v3000_v4, -inf }
 0xf29   :  { %3002 = vmax.xlane.f32.xlu0 %v3001_v19  ;;  %v3167_v18 = vpop.f32.mrb[30].mxu1 }
 0xf2a   :  { %v3171_v6 = vmul.f32 0.35355338, %v3167_v18  ;;  %v4276_v7 = vpop.f32.mrb[31].mxu1 }
 0xf2c   :  { %v3172_v8 = vsel %vm246_vm3, %v3171_v6, -inf }
 0xf2d   :  { %3173 = vmax.xlane.f32.xlu1 %v3172_v8  ;;  %v3338_v9 = vpop.f32.mrb[32].mxu1 }
 0xf2e   :  { %v3342_v10 = vmul.f32 0.35355338, %v3338_v9  ;;  %v4286_v11 = vpop.f32.mrb[33].mxu1 }
 0xf30   :  { %v3343_v12 = vsel %vm246_vm3, %v3342_v10, -inf }
 0xf31   :  { %3344 = vmax.xlane.f32.xlu0 %v3343_v12 }
 0xf3e   :  { %2675 = vrot.lane.b32.xlu1 %v4928_v32, %s5220_s29 }
 0xf47   :  { %2504 = vrot.lane.b32.xlu0 %v4928_v32, %s5221_s2 }
 0xfa2   :  { %v2157_v14 = vpop.xlane.xlu0 %2156 }
 0xfa3   :  { %v2158_v15 = vsub.f32 %v2154_v49, %v2157_v14  ;;  %v2324_v16 = vpop.xlane.xlu1 %2323 }
 0xfa4   :  { %v2325_v17 = vsub.f32 %v2321_v52, %v2324_v16 }
 0xfa5   :  { %v2159_v21 = vmul.f32 1.442695, %v2158_v15 }
 0xfa6   :  { %v2326_v22 = vmul.f32 1.442695, %v2325_v17 }
 0xfa7   :  { %4473 = vpow2.f32 %v2159_v21 }
 0xfa8   :  { %4475 = vpow2.f32 %v2326_v22 }
 0xfaa   :  { %v2495_v24 = vpop.xlane.xlu0 %2494 }
 0xfab   :  { %v2496_v26 = vsub.f32 %v2492_v57, %v2495_v24 }
 0xfad   :  { %v2497_v29 = vmul.f32 1.442695, %v2496_v26 }
 0xfae   :  { %v2666_v30 = vpop.xlane.xlu0 %2665 }
 0xfaf   :  { %4477 = vpow2.f32 %v2497_v29  ;;  %v2667_v31 = vsub.f32 %v2663_v61, %v2666_v30 }
 0xfb1   :  { %v4474_v34 = vpop.eup %4473  ;;  %v2668_v35 = vmul.f32 1.442695, %v2667_v31 }
 0xfb2   :  { %v4476_v36 = vpop.eup %4475  ;;  %v2161_v32 = vsel %vm246_vm3, %v4474_v34, 0.0  ;;  %v2836_v41 = vpop.xlane.xlu1 %2835 }
 0xfb3   :  { %4479 = vpow2.f32 %v2668_v35  ;;  %2162 = vadd.xlane.f32.xlu1 %v2161_v32  ;;  %v2328_v25 = vsel %vm246_vm3, %v4476_v36, 0.0  ;;  %v2837_v42 = vsub.f32 %v2833_v1, %v2836_v41  ;;  %v3904_v41 = vld [vmem:[%s5192_s6 + $0x30] sm:$0xff] }
 0xfb4   :  { %2329 = vadd.xlane.f32.xlu0 %v2328_v25 }
 0xfb5   :  { %v2838_v46 = vmul.f32 1.442695, %v2837_v42  ;;  %v3905_v42 = vld [vmem:[%s5192_s6 + $0x38] sm:$0xff] }
 0xfb6   :  { %v3003_v43 = vpop.xlane.xlu0 %3002 }
 0xfb7   :  { %v3004_v45 = vsub.f32 %v3000_v4, %v3003_v43  ;;  %4481 = vpow2.f32 %v2838_v46 }
 0xfb9   :  { %v4478_v37 = vpop.eup %4477  ;;  %v3005_v49 = vmul.f32 1.442695, %v3004_v45 }
 0xfba   :  { %v2499_v38 = vsel %vm246_vm3, %v4478_v37, 0.0  ;;  %v3174_v44 = vpop.xlane.xlu1 %3173 }
 0xfbb   :  { %2500 = vadd.xlane.f32.xlu1 %v2499_v38  ;;  %v3175_v47 = vsub.f32 %v3171_v6, %v3174_v44  ;;  %4483 = vpow2.f32 %v3005_v49  ;;  %v3903_v38 = vld [vmem:[%s5192_s6 + $0x28] sm:$0xff]  ;;  %v4389_v44 = vpack.c.bf16 %v3905_v42, %v3904_v41 }
 0xfbd   :  { %v5021_v39 = vpop.eup %4479  ;;  %v3176_v50 = vmul.f32 1.442695, %v3175_v47 }
 0xfbe   :  { %v2670_v40 = vsel %vm246_vm3, %v5021_v39, 0.0  ;;  %v3345_v48 = vpop.xlane.xlu0 %3344  ;;  %v2676_v61 = vpop.permute.xlu1 %2675 }
 0xfbf   :  { %2671 = vadd.xlane.f32.xlu0 %v2670_v40  ;;  %v3346_v51 = vsub.f32 %v3342_v10, %v3345_v48  ;;  %4485 = vpow2.f32 %v3176_v50 }
 0xfc1   :  { %v3347_v52 = vmul.f32 1.442695, %v3346_v51  ;;  %v4482_v53 = vpop.eup %4481 }
 0xfc2   :  { %v2840_v55 = vsel %vm246_vm3, %v4482_v53, 0.0  ;;  %v2505_v62 = vpop.permute.xlu0 %2504 }
 0xfc3   :  { %4487 = vpow2.f32 %v3347_v52 }
 0xfc5   :  { %v5029_v54 = vpop.eup %4483 }
 0xfc6   :  { %v3007_v57 = vsel %vm246_vm3, %v5029_v54, 0.0 }
 0xfc9   :  { %v5032_v56 = vpop.eup %4485 }
 0xfca   :  { %v3178_v58 = vsel %vm246_vm3, %v5032_v56, 0.0 }
 0xfcc   :  { %3012 = vrot.lane.b32.xlu1 %v4942_v33, %s5219_s30 }
 0xfcd   :  { %v5038_v59 = vpop.eup %4487 }
 0xfce   :  { %v3349_v60 = vsel %vm246_vm3, %v5038_v59, 0.0 }
 0xfd5   :  { %2845 = vrot.lane.b32.xlu0 %v4942_v33, %s5218_s5 }
 0xff0   :  { %2841 = vadd.xlane.f32.xlu1 %v2840_v55 }
 0xff4   :  { %3008 = vadd.xlane.f32.xlu0 %v3007_v57  ;;  %3179 = vadd.xlane.f32.xlu1 %v3178_v58 }
 0xff8   :  { %3350 = vadd.xlane.f32.xlu1 %v3349_v60 }
0x1009   :  { %3354 = vrot.lane.b32.xlu1 %v4942_v33, %s5220_s29 }
0x100a   :  { %3183 = vrot.lane.b32.xlu0 %v4942_v33, %s5221_s2 }
0x1040   :  { %v2163_v63 = vpop.xlane.xlu1 %2162 }
0x1041   :  { %4489 = vrcp.f32 %v2163_v63  ;;  %v2330_v0 = vpop.xlane.xlu0 %2329 }
0x1042   :  { %4491 = vrcp.f32 %v2330_v0 }
0x1048   :  { %v2501_v1 = vpop.xlane.xlu1 %2500 }
0x1049   :  { %4493 = vrcp.f32 %v2501_v1 }
0x104b   :  { %v4490_v2 = vpop.eup %4489 }
0x104c   :  { %v2165_v23 = vmul.f32 %v4490_v2, %v4474_v34  ;;  %v2672_v3 = vpop.xlane.xlu0 %2671  ;;  %v4492_v4 = vpop.eup %4491 }
0x104d   :  { %4495 = vrcp.f32 %v2672_v3  ;;  %v2332_v33 = vmul.f32 %v4492_v4, %v4476_v36  ;;  %v3013_v8 = vpop.permute.xlu1 %3012 }
0x104e   :  { %4220 = vmatmul.mubr.msk.f32.vlgmr.msra.gmra.mrb[26].mxu0 %vm246_vm3, %v2165_v23 }
0x104f   :  { %4228 = vmatpush3.msra.mxu0 %v5016_v13  ;;  %4229 = vmatprep.mubr.msk.f32.mxu0 %vm4514_vm2, %v4513_v20 }
0x1050   :  { %4237 = vmatprep.subr.mxu0 %v4513_v20  ;;  %v2846_v7 = vpop.permute.xlu0 %2845 }
0x1052   :  { %4230 = vmatmul.mubr.msk.f32.vlgmr.msra.gmra.mrb[28].mxu0 %vm246_vm3, %v2332_v33 }
0x1053   :  { %v4494_v5 = vpop.eup %4493  ;;  %4238 = vmatpush3.msra.mxu0 %v2505_v62  ;;  %4239 = vmatprep.mubr.msk.f32.mxu0 %vm4514_vm2, %v4513_v20 }
0x1054   :  { %v2503_v19 = vmul.f32 %v4494_v5, %v4478_v37  ;;  %4247 = vmatprep.subr.mxu0 %v4513_v20  ;;  %v3902_v37 = vld [vmem:[%s5192_s6 + $0x20] sm:$0xff] }
0x1056   :  { %4240 = vmatmul.mubr.msk.f32.vlgmr.msra.gmra.mrb[30].mxu0 %vm246_vm3, %v2503_v19 }
0x1057   :  { %v4496_v18 = vpop.eup %4495  ;;  %4248 = vmatpush3.msra.mxu0 %v2676_v61  ;;  %4249 = vmatprep.mubr.msk.f32.mxu0 %vm4514_vm2, %v4513_v20 }
0x1058   :  { %v2674_v6 = vmul.f32 %v4496_v18, %v5021_v39  ;;  %4257 = vmatprep.subr.mxu0 %v4513_v20  ;;  %v4385_v39 = vpack.c.bf16 %v3903_v38, %v3902_v37  ;;  %v3913_v38 = vld [vmem:[%s5197_s13 + $0x1] ss:$0 sm:$0xff] }
0x105a   :  { %4250 = vmatmul.mubr.msk.f32.vlgmr.msra.gmra.mrb[32].mxu0 %vm246_vm3, %v2674_v6  ;;  %4386 = vmatprep.subr.bf16.mxu1 %v4385_v39 }
0x105b   :  { %4258 = vmatpush3.msra.mxu0 %v2846_v7  ;;  %4259 = vmatprep.mubr.msk.f32.mxu0 %vm4514_vm2, %v4513_v20 }
0x105c   :  { %4267 = vmatprep.subr.mxu0 %v4513_v20  ;;  %4388 = vmatpush3.bf16.msra.mxu1 %v4385_v39 }
0x105d   :  { %4390 = vmatprep.subr.bf16.mxu1 %v4389_v44 }
0x1060   :  { %4392 = vmatpush3.bf16.msra.mxu1 %v4389_v44 }
0x107d   :  { %v2842_v9 = vpop.xlane.xlu1 %2841 }
0x107e   :  { %4497 = vrcp.f32 %v2842_v9  ;;  %v3915_v9 = vld [vmem:[%s5194_s8 + $0x28] sm:$0xff] }
0x1081   :  { %v3009_v10 = vpop.xlane.xlu0 %3008  ;;  %v3180_v11 = vpop.xlane.xlu1 %3179 }
0x1082   :  { %4499 = vrcp.f32 %v3009_v10 }
0x1083   :  { %4501 = vrcp.f32 %v3180_v11  ;;  %v3916_v11 = vld [vmem:[%s5194_s8 + $0x30] sm:$0xff] }
0x1085   :  { %v3351_v12 = vpop.xlane.xlu1 %3350  ;;  %v3184_v21 = vpop.permute.xlu0 %3183 }
0x1086   :  { %4503 = vrcp.f32 %v3351_v12  ;;  %v3917_v12 = vld [vmem:[%s5194_s8 + $0x38] sm:$0xff] }
0x1088   :  { %v4498_v13 = vpop.eup %4497 }
0x1089   :  { %v2844_v14 = vmul.f32 %v4498_v13, %v4482_v53  ;;  %v3355_v26 = vpop.permute.xlu1 %3354  ;;  %v4397_v13 = vpack.c.bf16 %v3917_v12, %v3916_v11  ;;  %v3936_v11 = vld [vmem:[%s5200_s14 + $0x1] ss:$0 sm:$0xff] }
0x108b   :  { %4260 = vmatmul.mubr.msk.f32.vlgmr.msra.gmra.mrb[34].mxu0 %vm246_vm3, %v2844_v14  ;;  %v3922_v14 = vld [vmem:[%s5195_s10 + $0x40] sm:$0xff] }
0x108c   :  { %v4500_v15 = vpop.eup %4499  ;;  %4268 = vmatpush3.msra.mxu0 %v3013_v8  ;;  %4269 = vmatprep.mubr.msk.f32.mxu0 %vm4514_vm2, %v4513_v20 }
0x108d   :  { %v3011_v16 = vmul.f32 %v4500_v15, %v5029_v54  ;;  %4277 = vmatprep.subr.mxu0 %v4513_v20  ;;  %v4502_v17 = vpop.eup %4501  ;;  %v3923_v15 = vld [vmem:[%s5195_s10 + $0x48] sm:$0xff] }
0x108e   :  { %v3182_v22 = vmul.f32 %v4502_v17, %v5032_v56  ;;  %v4401_v17 = vpack.c.bf16 %v3923_v15, %v3922_v14  ;;  %v3937_v14 = vld [vmem:[%s5201_s15 + $0x1] ss:$0 sm:$0xff] }
0x108f   :  { %4270 = vmatmul.mubr.msk.f32.vlgmr.msra.gmra.mrb[36].mxu0 %vm246_vm3, %v3011_v16  ;;  %v3924_v16 = vld [vmem:[%s5195_s10 + $0x50] sm:$0xff] }
0x1090   :  { %4278 = vmatpush3.msra.mxu0 %v3184_v21  ;;  %4279 = vmatprep.mubr.msk.f32.mxu0 %vm4514_vm2, %v4513_v20  ;;  %v4504_v24 = vpop.eup %4503  ;;  %v3925_v21 = vld [vmem:[%s5195_s10 + $0x58] sm:$0xff] }
0x1091   :  { %4287 = vmatprep.subr.mxu0 %v4513_v20  ;;  %v3353_v29 = vmul.f32 %v4504_v24, %v5038_v59  ;;  %v3907_v59 = vld [vmem:[%s5193_s7 + $0x1] ss:$0 sm:$0xff]  ;;  %4402 = vmatprep.subr.bf16.mxu1 %v4401_v17 }
0x1092   :  { %v3926_v24 = vld [vmem:[%s5195_s10 + $0x60] sm:$0xff] }
0x1093   :  { %4280 = vmatmul.mubr.msk.f32.vlgmr.msra.gmra.mrb[38].mxu0 %vm246_vm3, %v3182_v22  ;;  %v4405_v22 = vpack.c.bf16 %v3925_v21, %v3924_v16 }
0x1094   :  { %4288 = vmatpush3.msra.mxu0 %v3355_v26  ;;  %4289 = vmatprep.mubr.msk.f32.mxu0 %vm4514_vm2, %v4513_v20  ;;  %v3927_v26 = vld [vmem:[%s5195_s10 + $0x68] sm:$0xff] }
0x1097   :  { %4290 = vmatmul.mubr.msk.f32.vlgmr.msra.gmra.mrb[40].mxu0 %vm246_vm3, %v3353_v29  ;;  %v4409_v29 = vpack.c.bf16 %v3927_v26, %v3926_v24 }
0x1121   :  { %v2238_v30 = vpop.f32.mrb[26].mxu0 }
0x1122   :  { %2242 = vst.msk [vmem:[#allocation2] sm:$0xff] %vm246_vm3, %v2238_v30  ;;  %v4221_v31 = vpop.f32.mrb[27].mxu0 }
0x1125   :  { %v2405_v34 = vpop.f32.mrb[28].mxu0 }
0x1126   :  { %2410 = vrot.lane.b32.xlu0 %v2405_v34, %s4526_s24  ;;  %v4231_v35 = vpop.f32.mrb[29].mxu0 }
0x1129   :  { %v2576_v36 = vpop.f32.mrb[30].mxu0 }
0x112a   :  { %2581 = vrot.lane.b32.xlu1 %v2576_v36, %s5222_s17  ;;  %v4241_v32 = vpop.f32.mrb[31].mxu0 }
0x112d   :  { %v2747_v25 = vpop.f32.mrb[32].mxu0 }
0x112e   :  { %2752 = vrot.lane.b32.xlu1 %v2747_v25, %s5223_s18  ;;  %v4251_v20 = vpop.f32.mrb[33].mxu0 }
0x112f   :  { %v3912_v20 = vld [vmem:[%s5196_s12 + $0x1] ss:$0 sm:$0xff] }
0x115e   :  { %v2917_v40 = vpop.f32.mrb[34].mxu0 }
0x115f   :  { %2921 = vst.msk [vmem:[#allocation2 + $0x8] sm:$0xff] %vm246_vm3, %v2917_v40  ;;  %v4261_v43 = vpop.f32.mrb[35].mxu0 }
0x1162   :  { %v3084_v45 = vpop.f32.mrb[36].mxu0 }
0x1163   :  { %3089 = vrot.lane.b32.xlu0 %v3084_v45, %s4526_s24  ;;  %v4271_v46 = vpop.f32.mrb[37].mxu0  ;;  %v3928_v45 = vld [vmem:[%s5195_s10 + $0x70] sm:$0xff] }
0x1164   :  { %v3929_v46 = vld [vmem:[%s5195_s10 + $0x78] sm:$0xff] }
0x1166   :  { %v3255_v47 = vpop.f32.mrb[38].mxu0 }
0x1167   :  { %3260 = vrot.lane.b32.xlu0 %v3255_v47, %s5222_s17  ;;  %v4281_v48 = vpop.f32.mrb[39].mxu0  ;;  %v4413_v47 = vpack.c.bf16 %v3929_v46, %v3928_v45 }
0x1168   :  { %v3919_v48 = vld [vmem:[%s5198_s9 + $0x1] ss:$0 sm:$0xff] }
0x116a   :  { %v3426_v49 = vpop.f32.mrb[40].mxu0 }
0x116b   :  { %3431 = vrot.lane.b32.xlu1 %v3426_v49, %s5223_s18  ;;  %v4291_v50 = vpop.f32.mrb[41].mxu0 }
0x1198   :  { %v2411_v51 = vpop.permute.xlu0 %2410 }
0x1199   :  { %2413 = vst.msk [vmem:[#allocation2] sm:$0xff] %vm580_vm4, %v2411_v51 }
0x119c   :  { %v2582_v52 = vpop.permute.xlu1 %2581 }
0x119d   :  { %2584 = vst.msk [vmem:[#allocation2] sm:$0xff] %vm752_vm5, %v2582_v52 }
0x11a0   :  { %v2753_v53 = vpop.permute.xlu1 %2752 }
0x11a1   :  { %2755 = vst.msk [vmem:[#allocation2] sm:$0xff] %vm924_vm6, %v2753_v53 }
0x11a8   :  { %v3435_v54 = vld [vmem:[#allocation2] sm:$0xff] }
0x11a9   :  { %4300 = vmatprep.mubr.msk.f32.mxu1 %vm161_vm1, %v3435_v54 }
0x11d5   :  { %v3090_v55 = vpop.permute.xlu0 %3089 }
0x11d6   :  { %3092 = vst.msk [vmem:[#allocation2 + $0x8] sm:$0xff] %vm580_vm4, %v3090_v55  ;;  %v3931_v55 = vld [vmem:[%s5199_s11 + $0x1] ss:$0 sm:$0xff] }
0x11d9   :  { %v3261_v56 = vpop.permute.xlu0 %3260 }
0x11da   :  { %3263 = vst.msk [vmem:[#allocation2 + $0x8] sm:$0xff] %vm752_vm5, %v3261_v56 }
0x11dd   :  { %v3432_v57 = vpop.permute.xlu1 %3431 }
0x11de   :  { %3434 = vst.msk [vmem:[#allocation2 + $0x8] sm:$0xff] %vm924_vm6, %v3432_v57 }
0x11e5   :  { %v3436_v58 = vld [vmem:[#allocation2 + $0x8] sm:$0xff] }
0x11e6   :  { %4301 = vmatmul.mubr.msk.f32.vlgmr.msra.gmra.mrb[34].mxu1 %vm161_vm1, %v3436_v58 }
0x11e7   :  { %4404 = vmatpush3.bf16.msra.mxu1 %v4401_v17 }
0x11e8   :  { %4406 = vmatprep.subr.bf16.mxu1 %v4405_v22 }
0x11eb   :  { %4408 = vmatpush3.bf16.msra.mxu1 %v4405_v22 }
0x11ec   :  { %4410 = vmatprep.subr.bf16.mxu1 %v4409_v29 }
0x11ef   :  { %4412 = vmatpush3.bf16.msra.mxu1 %v4409_v29 }
0x11f0   :  { %4414 = vmatprep.subr.bf16.mxu1 %v4413_v47 }
0x11f3   :  { %4416 = vmatpush3.bf16.msra.mxu1 %v4413_v47 }
0x12b9   :  { %v4302_v60 = vpop.f32.mrb[34].mxu1 }
0x12ba   :  { %v3528_v61 = vadd.f32 %v4302_v60, %v3907_v59  ;;  %v3522_v62 = vpop.f32.mrb[35].mxu1 }
0x12bb   :  { %v3523_v63 = vadd.f32 %v3907_v59, %v3522_v62 }
0x12bc   :  { %v3532_v0 = vadd.f32 %v3528_v61, %v4917_v28 }
0x12bd   :  { %v3531_v1 = vadd.f32 %v3523_v63, %v4915_v27  ;;  %v3914_v27 = vld [vmem:[%s5194_s8 + $0x20] sm:$0xff] }
0x12be   :  { %v3540_v2 = vsel %vm161_vm1, %v3532_v0, 0.0  ;;  %v4393_v10 = vpack.c.bf16 %v3915_v9, %v3914_v27 }
0x12bf   :  { %3541 = vadd.xlane.f32.xlu1 %v3540_v2  ;;  %v3537_v23 = vsel %vm161_vm1, %v3531_v1, 0.0 }
0x12c0   :  { %3538 = vadd.xlane.f32.xlu0 %v3537_v23  ;;  %4394 = vmatprep.subr.bf16.mxu0 %v4393_v10 }
0x12c1   :  { %4396 = vmatpush3.bf16.msra.mxu0 %v4393_v10 }
0x12c2   :  { %4398 = vmatprep.subr.bf16.mxu0 %v4397_v13 }
0x12c5   :  { %4400 = vmatpush3.bf16.msra.mxu0 %v4397_v13 }
0x134c   :  { %v3542_v3 = vpop.xlane.xlu1 %3541 }
0x134d   :  { %v3544_v4 = vmul.f32 0.03125, %v3542_v3  ;;  %v3539_v33 = vpop.xlane.xlu0 %3538 }
0x134e   :  { %v3543_v5 = vmul.f32 0.03125, %v3539_v33 }
0x134f   :  { %v3546_v19 = vsub.f32 %v3532_v0, %v3544_v4 }
0x1350   :  { %v3545_v18 = vsub.f32 %v3531_v1, %v3543_v5 }
0x1351   :  { %v3548_v8 = vmul.f32 %v3546_v19, %v3546_v19 }
0x1352   :  { %v3547_v6 = vmul.f32 %v3545_v18, %v3545_v18 }
0x1353   :  { %v3552_v28 = vsel %vm161_vm1, %v3548_v8, 0.0 }
0x1354   :  { %v3549_v7 = vsel %vm161_vm1, %v3547_v6, 0.0 }
0x1355   :  { %3550 = vadd.xlane.f32.xlu0 %v3549_v7 }
0x1359   :  { %3553 = vadd.xlane.f32.xlu0 %v3552_v28 }
0x13e2   :  { %v3551_v30 = vpop.xlane.xlu0 %3550 }
0x13e3   :  { %v3555_v31 = vmul.f32 0.03125, %v3551_v30 }
0x13e5   :  { %v3557_v34 = vadd.f32 1e-05, %v3555_v31 }
0x13e6   :  { %v3554_v35 = vpop.xlane.xlu0 %3553 }
0x13e7   :  { %4505 = vrsqrt.f32 %v3557_v34  ;;  %v3556_v36 = vmul.f32 0.03125, %v3554_v35 }
0x13e9   :  { %v3558_v32 = vadd.f32 1e-05, %v3556_v36 }
0x13eb   :  { %4507 = vrsqrt.f32 %v3558_v32 }
0x13f1   :  { %v4506_v25 = vpop.eup %4505 }
0x13f2   :  { %v3561_v37 = vmul.f32 %v4506_v25, %v3545_v18 }
0x13f4   :  { %v3569_v39 = vmul.f32 %v3912_v20, %v3561_v37 }
0x13f5   :  { %v4508_v40 = vpop.eup %4507 }
0x13f6   :  { %v3562_v41 = vmul.f32 %v4508_v40, %v3546_v19  ;;  %v3577_v42 = vadd.f32 %v3913_v38, %v3569_v39 }
0x13f8   :  { %v3570_v43 = vmul.f32 %v3912_v20, %v3562_v41  ;;  %4311 = vmatprep.mubr.msk.f32.mxu0 %vm161_vm1, %v3577_v42 }
0x13fa   :  { %v3578_v44 = vadd.f32 %v3913_v38, %v3570_v43 }
0x13fc   :  { %4312 = vmatmul.mubr.msk.f32.vlgmr.msra.gmra.mrb[42].mxu0 %vm161_vm1, %v3578_v44 }
0x14cf   :  { %v4313_v49 = vpop.f32.mrb[42].mxu0 }
0x14d0   :  { %v3670_v50 = vadd.f32 %v4313_v49, %v3919_v48  ;;  %v3664_v51 = vpop.f32.mrb[43].mxu0 }
0x14d1   :  { %v3665_v52 = vadd.f32 %v3919_v48, %v3664_v51 }
0x14d2   :  { %v3674_v54 = vmax.f32 %v3670_v50, 0.0 }
0x14d3   :  { %v3673_v53 = vmax.f32 %v3665_v52, 0.0 }
0x14d5   :  { %4330 = vmatprep.mubr.msk.f32.mxu1 %vm1855_vm7, %v3673_v53 }
0x14d6   :  { %4331 = vmatmul.mubr.msk.f32.vlgmr.msra.gmra.mrb[36].mxu1 %vm1855_vm7, %v3674_v54 }
0x15a9   :  { %v4332_v56 = vpop.f32.mrb[36].mxu1 }
0x15aa   :  { %v3770_v57 = vadd.f32 %v4332_v56, %v3931_v55  ;;  %v3764_v58 = vpop.f32.mrb[37].mxu1 }
0x15ab   :  { %v3765_v59 = vadd.f32 %v3931_v55, %v3764_v58 }
0x15ac   :  { %v3774_v60 = vadd.f32 %v3770_v57, %v3578_v44 }
0x15ad   :  { %v3773_v61 = vadd.f32 %v3765_v59, %v3577_v42 }
0x15ae   :  { %v3782_v62 = vsel %vm161_vm1, %v3774_v60, 0.0 }
0x15af   :  { %3783 = vadd.xlane.f32.xlu0 %v3782_v62  ;;  %v3779_v63 = vsel %vm161_vm1, %v3773_v61, 0.0 }
0x15b0   :  { %3780 = vadd.xlane.f32.xlu1 %v3779_v63 }
0x163c   :  { %v3784_v0 = vpop.xlane.xlu0 %3783 }
0x163d   :  { %v3786_v1 = vmul.f32 0.03125, %v3784_v0  ;;  %v3781_v2 = vpop.xlane.xlu1 %3780 }
0x163e   :  { %v3785_v23 = vmul.f32 0.03125, %v3781_v2 }
0x163f   :  { %v3788_v3 = vsub.f32 %v3774_v60, %v3786_v1 }
0x1640   :  { %v3787_v4 = vsub.f32 %v3773_v61, %v3785_v23 }
0x1641   :  { %v3790_v33 = vmul.f32 %v3788_v3, %v3788_v3 }
0x1642   :  { %v3789_v5 = vmul.f32 %v3787_v4, %v3787_v4 }
0x1643   :  { %v3794_v19 = vsel %vm161_vm1, %v3790_v33, 0.0 }
0x1644   :  { %3795 = vadd.xlane.f32.xlu0 %v3794_v19  ;;  %v3791_v18 = vsel %vm161_vm1, %v3789_v5, 0.0 }
0x1645   :  { %3792 = vadd.xlane.f32.xlu1 %v3791_v18 }
0x16d1   :  { %v3796_v6 = vpop.xlane.xlu0 %3795 }
0x16d2   :  { %v3798_v7 = vmul.f32 0.03125, %v3796_v6  ;;  %v3793_v8 = vpop.xlane.xlu1 %3792 }
0x16d3   :  { %v3797_v28 = vmul.f32 0.03125, %v3793_v8 }
0x16d4   :  { %v3800_v27 = vadd.f32 1e-05, %v3798_v7 }
0x16d5   :  { %v3799_v9 = vadd.f32 1e-05, %v3797_v28 }
0x16d6   :  { %4509 = vrsqrt.f32 %v3800_v27 }
0x16d7   :  { %4511 = vrsqrt.f32 %v3799_v9 }
0x16e0   :  { %v4510_v10 = vpop.eup %4509 }
0x16e1   :  { %v4512_v12 = vpop.eup %4511  ;;  %v3804_v13 = vmul.f32 %v4510_v10, %v3788_v3 }
0x16e2   :  { %v3803_v15 = vmul.f32 %v4512_v12, %v3787_v4 }
0x16e3   :  { %v3812_v16 = vmul.f32 %v3936_v11, %v3804_v13 }
0x16e4   :  { %v3811_v17 = vmul.f32 %v3936_v11, %v3803_v15 }
0x16e5   :  { %v3820_v21 = vadd.f32 %v3937_v14, %v3812_v16 }
0x16e6   :  { %v3819_v22 = vadd.f32 %v3937_v14, %v3811_v17 }
0x16e7   :  { %3822 = vst.msk [vmem:[%s5202_s16 + $0x8] sm:$0xff] %vm161_vm1, %v3820_v21 }
0x16e8   :  { %3821 = vst.msk [vmem:[%s5202_s16] sm:$0xff] %vm161_vm1, %v3819_v22 }

</bundles_post_ra>
